<compile_context>
chip_gen: v6e
topology: v6e:2x2x1
jax: 0.10.0
libtpu: 0.0.40
codegen_flags: <defaults>
</compile_context>

<pallas_src>
import functools

import jax
import jax.numpy as jnp
from jax.experimental import pallas as pl
from jax.experimental.pallas import tpu as pltpu


# --------------------------------------------------------------------------- kernel

def _skm_kernel(x_ref, w9_ref, db_ref, w1_ref, b1_ref, proj_ref, o_ref, d_scr,
                *, H, W, P, m, base):
    """Fused SKM forward for one batch element.

    x_ref   : (C, Lp)       row-padded, row-major flattened image (no W padding)
    w9_ref  : (m, C, 9*C)   dilated conv weights, tap-major (compute dtype)
    db_ref  : (m, C, 1)     dilated conv biases (f32)
    w1_ref  : (C*r, C)      1x1 squeeze conv weight (f32)
    b1_ref  : (C*r, 1)      1x1 squeeze conv bias (f32)
    proj_ref: (m, C, C*r)   proj_weight re-laid-out: proj_ref[i, c, k] = proj[k, i*C + c]
    o_ref   : (C, H*W)      compact, lane-dense output
    d_scr   : (m-1, C, H*W) per-dilation features for branches 1..m-1
    """
    C, N = o_ref.shape                      # N = H * W
    cdt = w9_ref.dtype                      # MXU operand dtype (f32 or bf16)

    # Column index of every output position (all tap windows start at multiples
    # of W, so position n maps to column n % W).  Hoisted out of all loops.
    col = jax.lax.broadcasted_iota(jnp.int32, (1, N), 1) % W

    # ---- m dilated 3x3 convs:  D_i = W9_i @ [9 masked shifted views of x] + b_i
    f_s = jnp.zeros((C, N), jnp.float32)
    for i in range(m):
        dil = 2 * (i + 1)
        left_ok = col >= dil                # tap column w - dil is in-bounds
        right_ok = col < (W - dil)          # tap column w + dil is in-bounds
        taps = []
        for ki in range(3):
            for kj in range(3):
                # Static window of the flat image = (ki, kj) dilated tap.
                off = base + dil * (ki - 1) * W + dil * (kj - 1)
                win = x_ref[:, off:off + N]
                # Horizontal halo: zero the positions where the true conv reads
                # outside [0, W) (row-major flattening wraps those into the
                # neighbouring row, so they must be masked).
                if kj == 0:
                    win = jnp.where(left_ok, win, 0)
                elif kj == 2:
                    win = jnp.where(right_ok, win, 0)
                taps.append(win)
        x9 = jnp.concatenate(taps, axis=0).astype(cdt)           # (9C, N)
        d_i = jnp.dot(w9_ref[i], x9,
                      preferred_element_type=jnp.float32)        # (C, N) f32
        d_i = d_i + db_ref[i]
        if i > 0:                              # d_scr[0] was dead: branch 0 uses f_s
            d_scr[i - 1] = d_i.astype(d_scr.dtype)
        f_s = f_s + d_i

    # ---- global average pool (every column is a real pixel now) -------------------
    z = jnp.sum(f_s, axis=1, keepdims=True) * (1.0 / (H * W))    # (C, 1)

    # ---- squeeze (1x1 conv + ReLU) -------------------------------------------------
    s = jnp.maximum(jnp.dot(w1_ref[...], z, preferred_element_type=jnp.float32)
                    + b1_ref[...], 0.0)                          # (C*r, 1)

    # ---- per-branch channel softmax gating + weighted fusion ----------------------
    out = jnp.zeros((C, N), jnp.float32)
    for i in range(m):
        logit = jnp.dot(proj_ref[i], s, preferred_element_type=jnp.float32)
        e = jnp.exp(logit - jnp.max(logit, axis=0, keepdims=True))
        wgt = e / jnp.sum(e, axis=0, keepdims=True)              # softmax over C
        # Branch 0 uses F_s (not D_0): reproduces the PyTorch in-place `F_s += D`
        # aliasing of D_list[0].
        feat = f_s if i == 0 else d_scr[i - 1].astype(jnp.float32)
        out = out + feat * wgt

    o_ref[...] = out.astype(o_ref.dtype)                         # lane-dense store


# --------------------------------------------------------------------------- wrapper

def skm_pallas(x, kp, *, r=2, m=4, compute_dtype=jnp.float32):
    """SKM forward. x: (B, C, H, W) float32; kp: output of prepare_kernel_params.

    compute_dtype: dtype of the MXU operands (w9 / tap slab) and the per-branch
    scratch.  Use jnp.bfloat16 on v6e/v7x for the fast MXU path and lower VMEM.
    """
    B, C, H, W = x.shape
    P = 2 * m                               # max dilation == halo extent
    N = H * W
    Cr = C * r
    cd = jnp.dtype(compute_dtype)

    # Rows of zero padding so every dilated-tap window of the row-major flat image
    # stays in-bounds (vertical halo is real zeros; horizontal halo is masked in
    # the kernel, so no width padding and no post-kernel slice are needed).
    pad_rows = P + -(-P // W)               # P + ceil(P / W)
    base = pad_rows * W                     # flat offset of pixel (row 0, col 0)
    Lp = (H + 2 * pad_rows) * W

    # Single pad pass over x, then a free reshape to the flat layout.
    xf = jnp.pad(x, ((0, 0), (0, 0), (pad_rows, pad_rows), (0, 0))).reshape(B, C, Lp)

    # VMEM budget per grid step (incl. Pallas double buffering), with 2x margin.
    cb = cd.itemsize
    xb = jnp.dtype(x.dtype).itemsize
    est = (2 * C * Lp * xb                      # x block (double buffered)
           + 2 * C * N * xb                     # output block (double buffered)
           + max(m - 1, 1) * C * N * cb         # d_scr
           + 9 * C * N * cb                     # tap slab
           + 4 * C * N * 4                      # f_s / out / d_i temporaries
           + 2 * m * C * (9 * C + Cr) * 4)      # weights
    vmem_bytes = int(min(max(2 * est, 16 << 20), 64 << 20))

    kernel = functools.partial(_skm_kernel, H=H, W=W, P=P, m=m, base=base)
    out = pl.pallas_call(
        kernel,
        out_shape=jax.ShapeDtypeStruct((B, C, N), x.dtype),
        grid=(B,),
        in_specs=[
            pl.BlockSpec((None, C, Lp), lambda b: (b, 0, 0)),    # x (per batch)
            pl.BlockSpec((m, C, 9 * C), lambda b: (0, 0, 0)),    # dilated weights
            pl.BlockSpec((m, C, 1), lambda b: (0, 0, 0)),        # dilated biases
            pl.BlockSpec((Cr, C), lambda b: (0, 0)),             # conv1 weight
            pl.BlockSpec((Cr, 1), lambda b: (0, 0)),             # conv1 bias
            pl.BlockSpec((m, C, Cr), lambda b: (0, 0, 0)),       # proj weight
        ],
        out_specs=pl.BlockSpec((None, C, N), lambda b: (b, 0, 0)),
        scratch_shapes=[pltpu.VMEM((max(m - 1, 1), C, N), cd)],
        compiler_params=pltpu.CompilerParams(
            dimension_semantics=("parallel",),
            vmem_limit_bytes=vmem_bytes),
    )(xf, kp['w9'].astype(cd), kp['db'], kp['w1'], kp['b1'], kp['projA'])

    # Free reshape back to NCHW (no halo slicing needed: output is already compact).
    return out.reshape(B, C, H, W)


# --------------------------------------------------------------------------- params

def make_params(key, C, r, m):
    """Parameters in their natural PyTorch layouts."""
    ks = iter(jax.random.split(key, 8))

    def nrm(shape, s):
        return (s * jax.random.normal(next(ks), shape)).astype(jnp.float32)

    return {
        'dconv_w': nrm((m, C, C, 3, 3), 0.15),   # Conv2d(C, C, 3, dilation=2(i+1)).weight
        'dconv_b': nrm((m, C), 0.05),
        'conv1_w': nrm((C * r, C), 0.5),         # Conv2d(C, C*r, 1).weight (squeezed)
        'conv1_b': nrm((C * r,), 0.1),
        'proj_w': nrm((C * r, m * C), 0.5),      # nn.Parameter((C*r, m*C))
    }


def prepare_kernel_params(p, C, r, m):
    """One-time re-layout of the weights into the forms the kernel consumes."""
    Cr = C * r
    # Tap-major conv weights: w9[i, o, (ki*3+kj)*C + c] = dconv_w[i, o, c, ki, kj].
    w9 = jnp.stack([p['dconv_w'][i].transpose(0, 2, 3, 1).reshape(C, 9 * C)
                    for i in range(m)])
    return {
        'w9': w9,                                  # (m, C, 9C)
        'db': p['dconv_b'].reshape(m, C, 1),       # (m, C, 1)
        'w1': p['conv1_w'],                        # (Cr, C)
        'b1': p['conv1_b'].reshape(Cr, 1),         # (Cr, 1)
        'projA': p['proj_w'].T.reshape(m, C, Cr),  # projA[i, c, k] = proj[k, i*C + c]
    }


# ----------------------------------------------------------- reference (pure JAX, NCHW)

def skm_reference(x, p, *, r=2, m=4):
    """Faithful reference of the PyTorch forward (including the D_list[0] aliasing)."""
    B, C, H, W = x.shape
    hi = jax.lax.Precision.HIGHEST
    d_list = []
    for i in range(m):
        dil = 2 * (i + 1)
        d_i = jax.lax.conv_general_dilated(
            x, p['dconv_w'][i], window_strides=(1, 1),
            padding=((dil, dil), (dil, dil)), rhs_dilation=(dil, dil),
            dimension_numbers=('NCHW', 'OIHW', 'NCHW'), precision=hi)
        d_list.append(d_i + p['dconv_b'][i][None, :, None, None])
    f_s = sum(d_list)
    z = jnp.mean(f_s, axis=(2, 3))                                       # (B, C)
    s = jnp.maximum(jnp.einsum('bc,oc->bo', z, p['conv1_w'], precision=hi)
                    + p['conv1_b'][None, :], 0.0)                        # (B, C*r)
    sw = jnp.einsum('bk,kn->bn', s, p['proj_w'], precision=hi)           # (B, m*C)
    sw = jax.nn.softmax(sw.reshape(B, m, C), axis=-1)                    # (B, m, C)
    # Branch 0 uses F_s because of the in-place `F_s += D` aliasing in the module.
    out = f_s * sw[:, 0, :, None, None]
    for i in range(1, m):
        out = out + d_list[i] * sw[:, i, :, None, None]
    return out


# --------------------------------------------------------------------------- main

if __name__ == "__main__":
    B, C, H, W = 2, 8, 16, 16
    R, M = 2, 4

    key = jax.random.PRNGKey(0)
    k_x, k_p = jax.random.split(key)
    x = jax.random.normal(k_x, (B, C, H, W), dtype=jnp.float32)
    params = make_params(k_p, C, R, M)
    kparams = prepare_kernel_params(params, C, R, M)

    ref = skm_reference(x, params, r=R, m=M)

    # Strict correctness check: f32 operand path.
    fwd = jax.jit(functools.partial(skm_pallas, r=R, m=M))
    out = fwd(x, kparams)
    jax.block_until_ready(out)
    err = float(jnp.max(jnp.abs(out - ref)))
    assert err < 5e-3, f"f32 path max abs err {err}"

    # Fast path for v6e/v7x: bf16 MXU operands / bf16 scratch, f32 accumulation.
    # Looser tolerance accounts for bf16 operand rounding only.
    fwd_bf16 = jax.jit(functools.partial(skm_pallas, r=R, m=M,
                                         compute_dtype=jnp.bfloat16))
    out_b = fwd_bf16(x, kparams)
    jax.block_until_ready(out_b)
    err_b = float(jnp.max(jnp.abs(out_b - ref)))
    assert err_b < 7.5e-2, f"bf16 path max abs err {err_b}"

    print("KERNEL_OK")
</pallas_src>

<mosaic_0001>
module attributes {stable_mosaic.version = 11 : i64} {
  func.func @_skm_kernel(%arg0: i32, %arg1: memref<1x8x544xf32, #tpu.memory_space<vmem>>, %arg2: memref<4x8x72xf32, #tpu.memory_space<vmem>>, %arg3: memref<4x8x1xf32, #tpu.memory_space<vmem>>, %arg4: memref<16x8xf32, #tpu.memory_space<vmem>>, %arg5: memref<16x1xf32, #tpu.memory_space<vmem>>, %arg6: memref<4x8x16xf32, #tpu.memory_space<vmem>>, %arg7: memref<1x8x256xf32, #tpu.memory_space<vmem>>, %arg8: memref<3x8x256xf32, #tpu.memory_space<vmem>>) attributes {dimension_semantics = [#tpu.dimension_semantics<parallel>], iteration_bounds = array<i64: 2>, scalar_prefetch = 0 : i64, scratch_operands = 1 : i64, tpu.core_type = #tpu.core_type<tc>, window_params = [{transform_indices = @transform_0, window_bounds = array<i64: 1, 8, 544>}, {pipeline_mode = #tpu.pipeline_mode<synchronous>, transform_indices = @transform_1, window_bounds = array<i64: 4, 8, 72>}, {pipeline_mode = #tpu.pipeline_mode<synchronous>, transform_indices = @transform_2, window_bounds = array<i64: 4, 8, 1>}, {pipeline_mode = #tpu.pipeline_mode<synchronous>, transform_indices = @transform_3, window_bounds = array<i64: 16, 8>}, {pipeline_mode = #tpu.pipeline_mode<synchronous>, transform_indices = @transform_4, window_bounds = array<i64: 16, 1>}, {pipeline_mode = #tpu.pipeline_mode<synchronous>, transform_indices = @transform_5, window_bounds = array<i64: 4, 8, 16>}, {transform_indices = @transform_6, window_bounds = array<i64: 1, 8, 256>}]} {
    %0 = tpu.iota {dimensions = array<i32: 1>} : vector<1x256xi32>
    %c16_i32 = arith.constant 16 : i32
    %c0_i32 = arith.constant 0 : i32
    %1 = arith.cmpi eq, %c16_i32, %c0_i32 : i32
    %c1_i32 = arith.constant 1 : i32
    %2 = arith.select %1, %c1_i32, %c16_i32 : i32
    %3 = vector.broadcast %2 : i32 to vector<1x256xi32>
    %4 = arith.remsi %0, %3 : vector<1x256xi32>
    %c0_i32_0 = arith.constant 0 : i32
    %5 = vector.broadcast %c0_i32_0 : i32 to vector<1x256xi32>
    %6 = arith.cmpi ne, %4, %5 : vector<1x256xi32>
    %c0_i32_1 = arith.constant 0 : i32
    %7 = vector.broadcast %c0_i32_1 : i32 to vector<1x256xi32>
    %8 = arith.cmpi slt, %4, %7 : vector<1x256xi32>
    %c0_i32_2 = arith.constant 0 : i32
    %9 = arith.cmpi slt, %2, %c0_i32_2 : i32
    %10 = vector.broadcast %9 : i1 to vector<1x256xi1>
    %11 = vector.broadcast %10 : vector<1x256xi1> to vector<1x256xi1>
    %12 = arith.xori %8, %11 : vector<1x256xi1>
    %13 = arith.andi %12, %6 : vector<1x256xi1>
    %14 = vector.broadcast %2 : i32 to vector<1x256xi32>
    %15 = arith.addi %4, %14 : vector<1x256xi32>
    %16 = arith.select %13, %15, %4 : vector<1x256xi1>, vector<1x256xi32>
    %cst = arith.constant 0.000000e+00 : f32
    %17 = vector.broadcast %cst : f32 to vector<8x256xf32>
    %c2_i32 = arith.constant 2 : i32
    %18 = vector.broadcast %c2_i32 : i32 to vector<1x256xi32>
    %19 = arith.cmpi sge, %16, %18 : vector<1x256xi32>
    %c14_i32 = arith.constant 14 : i32
    %20 = vector.broadcast %c14_i32 : i32 to vector<1x256xi32>
    %21 = arith.cmpi slt, %16, %20 : vector<1x256xi32>
    %c0 = arith.constant 0 : index
    %c0_3 = arith.constant 0 : index
    %c110 = arith.constant 110 : index
    %22 = vector.load %arg1[%c0, %c0_3, %c110] : memref<1x8x544xf32, #tpu.memory_space<vmem>>, vector<1x8x256xf32>
    %23 = vector.shape_cast %22 : vector<1x8x256xf32> to vector<8x256xf32>
    %c0_i32_4 = arith.constant 0 : i32
    %24 = arith.sitofp %c0_i32_4 : i32 to f32
    %25 = vector.shape_cast %19 : vector<1x256xi1> to vector<1x256xi1>
    %26 = vector.broadcast %25 : vector<1x256xi1> to vector<8x256xi1>
    %27 = vector.broadcast %24 : f32 to vector<8x256xf32>
    %28 = arith.select %26, %23, %27 : vector<8x256xi1>, vector<8x256xf32>
    %c0_5 = arith.constant 0 : index
    %c0_6 = arith.constant 0 : index
    %c112 = arith.constant 112 : index
    %29 = vector.load %arg1[%c0_5, %c0_6, %c112] : memref<1x8x544xf32, #tpu.memory_space<vmem>>, vector<1x8x256xf32>
    %30 = vector.shape_cast %29 : vector<1x8x256xf32> to vector<8x256xf32>
    %c0_7 = arith.constant 0 : index
    %c0_8 = arith.constant 0 : index
    %c114 = arith.constant 114 : index
    %31 = vector.load %arg1[%c0_7, %c0_8, %c114] : memref<1x8x544xf32, #tpu.memory_space<vmem>>, vector<1x8x256xf32>
    %32 = vector.shape_cast %31 : vector<1x8x256xf32> to vector<8x256xf32>
    %c0_i32_9 = arith.constant 0 : i32
    %33 = arith.sitofp %c0_i32_9 : i32 to f32
    %34 = vector.shape_cast %21 : vector<1x256xi1> to vector<1x256xi1>
    %35 = vector.broadcast %34 : vector<1x256xi1> to vector<8x256xi1>
    %36 = vector.broadcast %33 : f32 to vector<8x256xf32>
    %37 = arith.select %35, %32, %36 : vector<8x256xi1>, vector<8x256xf32>
    %c0_10 = arith.constant 0 : index
    %c0_11 = arith.constant 0 : index
    %c142 = arith.constant 142 : index
    %38 = vector.load %arg1[%c0_10, %c0_11, %c142] : memref<1x8x544xf32, #tpu.memory_space<vmem>>, vector<1x8x256xf32>
    %39 = vector.shape_cast %38 : vector<1x8x256xf32> to vector<8x256xf32>
    %c0_i32_12 = arith.constant 0 : i32
    %40 = arith.sitofp %c0_i32_12 : i32 to f32
    %41 = vector.shape_cast %19 : vector<1x256xi1> to vector<1x256xi1>
    %42 = vector.broadcast %41 : vector<1x256xi1> to vector<8x256xi1>
    %43 = vector.broadcast %40 : f32 to vector<8x256xf32>
    %44 = arith.select %42, %39, %43 : vector<8x256xi1>, vector<8x256xf32>
    %c0_13 = arith.constant 0 : index
    %c0_14 = arith.constant 0 : index
    %c144 = arith.constant 144 : index
    %45 = vector.load %arg1[%c0_13, %c0_14, %c144] : memref<1x8x544xf32, #tpu.memory_space<vmem>>, vector<1x8x256xf32>
    %46 = vector.shape_cast %45 : vector<1x8x256xf32> to vector<8x256xf32>
    %c0_15 = arith.constant 0 : index
    %c0_16 = arith.constant 0 : index
    %c146 = arith.constant 146 : index
    %47 = vector.load %arg1[%c0_15, %c0_16, %c146] : memref<1x8x544xf32, #tpu.memory_space<vmem>>, vector<1x8x256xf32>
    %48 = vector.shape_cast %47 : vector<1x8x256xf32> to vector<8x256xf32>
    %c0_i32_17 = arith.constant 0 : i32
    %49 = arith.sitofp %c0_i32_17 : i32 to f32
    %50 = vector.shape_cast %21 : vector<1x256xi1> to vector<1x256xi1>
    %51 = vector.broadcast %50 : vector<1x256xi1> to vector<8x256xi1>
    %52 = vector.broadcast %49 : f32 to vector<8x256xf32>
    %53 = arith.select %51, %48, %52 : vector<8x256xi1>, vector<8x256xf32>
    %c0_18 = arith.constant 0 : index
    %c0_19 = arith.constant 0 : index
    %c174 = arith.constant 174 : index
    %54 = vector.load %arg1[%c0_18, %c0_19, %c174] : memref<1x8x544xf32, #tpu.memory_space<vmem>>, vector<1x8x256xf32>
    %55 = vector.shape_cast %54 : vector<1x8x256xf32> to vector<8x256xf32>
    %c0_i32_20 = arith.constant 0 : i32
    %56 = arith.sitofp %c0_i32_20 : i32 to f32
    %57 = vector.shape_cast %19 : vector<1x256xi1> to vector<1x256xi1>
    %58 = vector.broadcast %57 : vector<1x256xi1> to vector<8x256xi1>
    %59 = vector.broadcast %56 : f32 to vector<8x256xf32>
    %60 = arith.select %58, %55, %59 : vector<8x256xi1>, vector<8x256xf32>
    %c0_21 = arith.constant 0 : index
    %c0_22 = arith.constant 0 : index
    %c176 = arith.constant 176 : index
    %61 = vector.load %arg1[%c0_21, %c0_22, %c176] : memref<1x8x544xf32, #tpu.memory_space<vmem>>, vector<1x8x256xf32>
    %62 = vector.shape_cast %61 : vector<1x8x256xf32> to vector<8x256xf32>
    %c0_23 = arith.constant 0 : index
    %c0_24 = arith.constant 0 : index
    %c178 = arith.constant 178 : index
    %63 = vector.load %arg1[%c0_23, %c0_24, %c178] : memref<1x8x544xf32, #tpu.memory_space<vmem>>, vector<1x8x256xf32>
    %64 = vector.shape_cast %63 : vector<1x8x256xf32> to vector<8x256xf32>
    %c0_i32_25 = arith.constant 0 : i32
    %65 = arith.sitofp %c0_i32_25 : i32 to f32
    %66 = vector.shape_cast %21 : vector<1x256xi1> to vector<1x256xi1>
    %67 = vector.broadcast %66 : vector<1x256xi1> to vector<8x256xi1>
    %68 = vector.broadcast %65 : f32 to vector<8x256xf32>
    %69 = arith.select %67, %64, %68 : vector<8x256xi1>, vector<8x256xf32>
    %70 = tpu.concatenate %28, %30, %37, %44, %46, %53, %60, %62, %69 in 0 : vector<8x256xf32>, vector<8x256xf32>, vector<8x256xf32>, vector<8x256xf32>, vector<8x256xf32>, vector<8x256xf32>, vector<8x256xf32>, vector<8x256xf32>, vector<8x256xf32> -> vector<72x256xf32>
    %c0_26 = arith.constant 0 : index
    %c0_27 = arith.constant 0 : index
    %c0_28 = arith.constant 0 : index
    %71 = vector.load %arg2[%c0_26, %c0_27, %c0_28] : memref<4x8x72xf32, #tpu.memory_space<vmem>>, vector<1x8x72xf32>
    %72 = vector.shape_cast %71 : vector<1x8x72xf32> to vector<8x72xf32>
    %cst_29 = arith.constant dense<0.000000e+00> : vector<8x256xf32>
    %73 = tpu.matmul %72, %70, %cst_29 {dimension_numbers = #tpu.dot_dimension_numbers<[1], [0], [0], [1], [0, 0, 1, 1], [], []>} : vector<8x72xf32>, vector<72x256xf32>, vector<8x256xf32> -> vector<8x256xf32>
    %c0_30 = arith.constant 0 : index
    %c0_31 = arith.constant 0 : index
    %c0_32 = arith.constant 0 : index
    %74 = vector.load %arg3[%c0_30, %c0_31, %c0_32] : memref<4x8x1xf32, #tpu.memory_space<vmem>>, vector<1x8x1xf32>
    %75 = vector.shape_cast %74 : vector<1x8x1xf32> to vector<8x1xf32>
    %76 = vector.broadcast %75 : vector<8x1xf32> to vector<8x256xf32>
    %77 = arith.addf %73, %76 : vector<8x256xf32>
    %78 = arith.addf %17, %77 : vector<8x256xf32>
    %c4_i32 = arith.constant 4 : i32
    %79 = vector.broadcast %c4_i32 : i32 to vector<1x256xi32>
    %80 = arith.cmpi sge, %16, %79 : vector<1x256xi32>
    %c12_i32 = arith.constant 12 : i32
    %81 = vector.broadcast %c12_i32 : i32 to vector<1x256xi32>
    %82 = arith.cmpi slt, %16, %81 : vector<1x256xi32>
    %c0_33 = arith.constant 0 : index
    %c0_34 = arith.constant 0 : index
    %c76 = arith.constant 76 : index
    %83 = vector.load %arg1[%c0_33, %c0_34, %c76] : memref<1x8x544xf32, #tpu.memory_space<vmem>>, vector<1x8x256xf32>
    %84 = vector.shape_cast %83 : vector<1x8x256xf32> to vector<8x256xf32>
    %c0_i32_35 = arith.constant 0 : i32
    %85 = arith.sitofp %c0_i32_35 : i32 to f32
    %86 = vector.shape_cast %80 : vector<1x256xi1> to vector<1x256xi1>
    %87 = vector.broadcast %86 : vector<1x256xi1> to vector<8x256xi1>
    %88 = vector.broadcast %85 : f32 to vector<8x256xf32>
    %89 = arith.select %87, %84, %88 : vector<8x256xi1>, vector<8x256xf32>
    %c0_36 = arith.constant 0 : index
    %c0_37 = arith.constant 0 : index
    %c80 = arith.constant 80 : index
    %90 = vector.load %arg1[%c0_36, %c0_37, %c80] : memref<1x8x544xf32, #tpu.memory_space<vmem>>, vector<1x8x256xf32>
    %91 = vector.shape_cast %90 : vector<1x8x256xf32> to vector<8x256xf32>
    %c0_38 = arith.constant 0 : index
    %c0_39 = arith.constant 0 : index
    %c84 = arith.constant 84 : index
    %92 = vector.load %arg1[%c0_38, %c0_39, %c84] : memref<1x8x544xf32, #tpu.memory_space<vmem>>, vector<1x8x256xf32>
    %93 = vector.shape_cast %92 : vector<1x8x256xf32> to vector<8x256xf32>
    %c0_i32_40 = arith.constant 0 : i32
    %94 = arith.sitofp %c0_i32_40 : i32 to f32
    %95 = vector.shape_cast %82 : vector<1x256xi1> to vector<1x256xi1>
    %96 = vector.broadcast %95 : vector<1x256xi1> to vector<8x256xi1>
    %97 = vector.broadcast %94 : f32 to vector<8x256xf32>
    %98 = arith.select %96, %93, %97 : vector<8x256xi1>, vector<8x256xf32>
    %c0_41 = arith.constant 0 : index
    %c0_42 = arith.constant 0 : index
    %c140 = arith.constant 140 : index
    %99 = vector.load %arg1[%c0_41, %c0_42, %c140] : memref<1x8x544xf32, #tpu.memory_space<vmem>>, vector<1x8x256xf32>
    %100 = vector.shape_cast %99 : vector<1x8x256xf32> to vector<8x256xf32>
    %c0_i32_43 = arith.constant 0 : i32
    %101 = arith.sitofp %c0_i32_43 : i32 to f32
    %102 = vector.shape_cast %80 : vector<1x256xi1> to vector<1x256xi1>
    %103 = vector.broadcast %102 : vector<1x256xi1> to vector<8x256xi1>
    %104 = vector.broadcast %101 : f32 to vector<8x256xf32>
    %105 = arith.select %103, %100, %104 : vector<8x256xi1>, vector<8x256xf32>
    %c0_44 = arith.constant 0 : index
    %c0_45 = arith.constant 0 : index
    %c144_46 = arith.constant 144 : index
    %106 = vector.load %arg1[%c0_44, %c0_45, %c144_46] : memref<1x8x544xf32, #tpu.memory_space<vmem>>, vector<1x8x256xf32>
    %107 = vector.shape_cast %106 : vector<1x8x256xf32> to vector<8x256xf32>
    %c0_47 = arith.constant 0 : index
    %c0_48 = arith.constant 0 : index
    %c148 = arith.constant 148 : index
    %108 = vector.load %arg1[%c0_47, %c0_48, %c148] : memref<1x8x544xf32, #tpu.memory_space<vmem>>, vector<1x8x256xf32>
    %109 = vector.shape_cast %108 : vector<1x8x256xf32> to vector<8x256xf32>
    %c0_i32_49 = arith.constant 0 : i32
    %110 = arith.sitofp %c0_i32_49 : i32 to f32
    %111 = vector.shape_cast %82 : vector<1x256xi1> to vector<1x256xi1>
    %112 = vector.broadcast %111 : vector<1x256xi1> to vector<8x256xi1>
    %113 = vector.broadcast %110 : f32 to vector<8x256xf32>
    %114 = arith.select %112, %109, %113 : vector<8x256xi1>, vector<8x256xf32>
    %c0_50 = arith.constant 0 : index
    %c0_51 = arith.constant 0 : index
    %c204 = arith.constant 204 : index
    %115 = vector.load %arg1[%c0_50, %c0_51, %c204] : memref<1x8x544xf32, #tpu.memory_space<vmem>>, vector<1x8x256xf32>
    %116 = vector.shape_cast %115 : vector<1x8x256xf32> to vector<8x256xf32>
    %c0_i32_52 = arith.constant 0 : i32
    %117 = arith.sitofp %c0_i32_52 : i32 to f32
    %118 = vector.shape_cast %80 : vector<1x256xi1> to vector<1x256xi1>
    %119 = vector.broadcast %118 : vector<1x256xi1> to vector<8x256xi1>
    %120 = vector.broadcast %117 : f32 to vector<8x256xf32>
    %121 = arith.select %119, %116, %120 : vector<8x256xi1>, vector<8x256xf32>
    %c0_53 = arith.constant 0 : index
    %c0_54 = arith.constant 0 : index
    %c208 = arith.constant 208 : index
    %122 = vector.load %arg1[%c0_53, %c0_54, %c208] : memref<1x8x544xf32, #tpu.memory_space<vmem>>, vector<1x8x256xf32>
    %123 = vector.shape_cast %122 : vector<1x8x256xf32> to vector<8x256xf32>
    %c0_55 = arith.constant 0 : index
    %c0_56 = arith.constant 0 : index
    %c212 = arith.constant 212 : index
    %124 = vector.load %arg1[%c0_55, %c0_56, %c212] : memref<1x8x544xf32, #tpu.memory_space<vmem>>, vector<1x8x256xf32>
    %125 = vector.shape_cast %124 : vector<1x8x256xf32> to vector<8x256xf32>
    %c0_i32_57 = arith.constant 0 : i32
    %126 = arith.sitofp %c0_i32_57 : i32 to f32
    %127 = vector.shape_cast %82 : vector<1x256xi1> to vector<1x256xi1>
    %128 = vector.broadcast %127 : vector<1x256xi1> to vector<8x256xi1>
    %129 = vector.broadcast %126 : f32 to vector<8x256xf32>
    %130 = arith.select %128, %125, %129 : vector<8x256xi1>, vector<8x256xf32>
    %131 = tpu.concatenate %89, %91, %98, %105, %107, %114, %121, %123, %130 in 0 : vector<8x256xf32>, vector<8x256xf32>, vector<8x256xf32>, vector<8x256xf32>, vector<8x256xf32>, vector<8x256xf32>, vector<8x256xf32>, vector<8x256xf32>, vector<8x256xf32> -> vector<72x256xf32>
    %c1 = arith.constant 1 : index
    %c0_58 = arith.constant 0 : index
    %c0_59 = arith.constant 0 : index
    %132 = vector.load %arg2[%c1, %c0_58, %c0_59] : memref<4x8x72xf32, #tpu.memory_space<vmem>>, vector<1x8x72xf32>
    %133 = vector.shape_cast %132 : vector<1x8x72xf32> to vector<8x72xf32>
    %cst_60 = arith.constant dense<0.000000e+00> : vector<8x256xf32>
    %134 = tpu.matmul %133, %131, %cst_60 {dimension_numbers = #tpu.dot_dimension_numbers<[1], [0], [0], [1], [0, 0, 1, 1], [], []>} : vector<8x72xf32>, vector<72x256xf32>, vector<8x256xf32> -> vector<8x256xf32>
    %c1_61 = arith.constant 1 : index
    %c0_62 = arith.constant 0 : index
    %c0_63 = arith.constant 0 : index
    %135 = vector.load %arg3[%c1_61, %c0_62, %c0_63] : memref<4x8x1xf32, #tpu.memory_space<vmem>>, vector<1x8x1xf32>
    %136 = vector.shape_cast %135 : vector<1x8x1xf32> to vector<8x1xf32>
    %137 = vector.broadcast %136 : vector<8x1xf32> to vector<8x256xf32>
    %138 = arith.addf %134, %137 : vector<8x256xf32>
    %c0_64 = arith.constant 0 : index
    %c0_65 = arith.constant 0 : index
    %c0_66 = arith.constant 0 : index
    %139 = vector.load %arg8[%c0_64, %c0_65, %c0_66] : memref<3x8x256xf32, #tpu.memory_space<vmem>>, vector<1x8x256xf32>
    %140 = vector.shape_cast %139 : vector<1x8x256xf32> to vector<8x256xf32>
    %141 = vector.shape_cast %138 : vector<8x256xf32> to vector<1x8x256xf32>
    tpu.vector_store %arg8[%c0_64, %c0_65, %c0_66], %141 {strides = array<i32>} : memref<3x8x256xf32, #tpu.memory_space<vmem>>, vector<1x8x256xf32>,
    %142 = arith.addf %78, %138 : vector<8x256xf32>
    %c6_i32 = arith.constant 6 : i32
    %143 = vector.broadcast %c6_i32 : i32 to vector<1x256xi32>
    %144 = arith.cmpi sge, %16, %143 : vector<1x256xi32>
    %c10_i32 = arith.constant 10 : i32
    %145 = vector.broadcast %c10_i32 : i32 to vector<1x256xi32>
    %146 = arith.cmpi slt, %16, %145 : vector<1x256xi32>
    %c0_67 = arith.constant 0 : index
    %c0_68 = arith.constant 0 : index
    %c42 = arith.constant 42 : index
    %147 = vector.load %arg1[%c0_67, %c0_68, %c42] : memref<1x8x544xf32, #tpu.memory_space<vmem>>, vector<1x8x256xf32>
    %148 = vector.shape_cast %147 : vector<1x8x256xf32> to vector<8x256xf32>
    %c0_i32_69 = arith.constant 0 : i32
    %149 = arith.sitofp %c0_i32_69 : i32 to f32
    %150 = vector.shape_cast %144 : vector<1x256xi1> to vector<1x256xi1>
    %151 = vector.broadcast %150 : vector<1x256xi1> to vector<8x256xi1>
    %152 = vector.broadcast %149 : f32 to vector<8x256xf32>
    %153 = arith.select %151, %148, %152 : vector<8x256xi1>, vector<8x256xf32>
    %c0_70 = arith.constant 0 : index
    %c0_71 = arith.constant 0 : index
    %c48 = arith.constant 48 : index
    %154 = vector.load %arg1[%c0_70, %c0_71, %c48] : memref<1x8x544xf32, #tpu.memory_space<vmem>>, vector<1x8x256xf32>
    %155 = vector.shape_cast %154 : vector<1x8x256xf32> to vector<8x256xf32>
    %c0_72 = arith.constant 0 : index
    %c0_73 = arith.constant 0 : index
    %c54 = arith.constant 54 : index
    %156 = vector.load %arg1[%c0_72, %c0_73, %c54] : memref<1x8x544xf32, #tpu.memory_space<vmem>>, vector<1x8x256xf32>
    %157 = vector.shape_cast %156 : vector<1x8x256xf32> to vector<8x256xf32>
    %c0_i32_74 = arith.constant 0 : i32
    %158 = arith.sitofp %c0_i32_74 : i32 to f32
    %159 = vector.shape_cast %146 : vector<1x256xi1> to vector<1x256xi1>
    %160 = vector.broadcast %159 : vector<1x256xi1> to vector<8x256xi1>
    %161 = vector.broadcast %158 : f32 to vector<8x256xf32>
    %162 = arith.select %160, %157, %161 : vector<8x256xi1>, vector<8x256xf32>
    %c0_75 = arith.constant 0 : index
    %c0_76 = arith.constant 0 : index
    %c138 = arith.constant 138 : index
    %163 = vector.load %arg1[%c0_75, %c0_76, %c138] : memref<1x8x544xf32, #tpu.memory_space<vmem>>, vector<1x8x256xf32>
    %164 = vector.shape_cast %163 : vector<1x8x256xf32> to vector<8x256xf32>
    %c0_i32_77 = arith.constant 0 : i32
    %165 = arith.sitofp %c0_i32_77 : i32 to f32
    %166 = vector.shape_cast %144 : vector<1x256xi1> to vector<1x256xi1>
    %167 = vector.broadcast %166 : vector<1x256xi1> to vector<8x256xi1>
    %168 = vector.broadcast %165 : f32 to vector<8x256xf32>
    %169 = arith.select %167, %164, %168 : vector<8x256xi1>, vector<8x256xf32>
    %c0_78 = arith.constant 0 : index
    %c0_79 = arith.constant 0 : index
    %c144_80 = arith.constant 144 : index
    %170 = vector.load %arg1[%c0_78, %c0_79, %c144_80] : memref<1x8x544xf32, #tpu.memory_space<vmem>>, vector<1x8x256xf32>
    %171 = vector.shape_cast %170 : vector<1x8x256xf32> to vector<8x256xf32>
    %c0_81 = arith.constant 0 : index
    %c0_82 = arith.constant 0 : index
    %c150 = arith.constant 150 : index
    %172 = vector.load %arg1[%c0_81, %c0_82, %c150] : memref<1x8x544xf32, #tpu.memory_space<vmem>>, vector<1x8x256xf32>
    %173 = vector.shape_cast %172 : vector<1x8x256xf32> to vector<8x256xf32>
    %c0_i32_83 = arith.constant 0 : i32
    %174 = arith.sitofp %c0_i32_83 : i32 to f32
    %175 = vector.shape_cast %146 : vector<1x256xi1> to vector<1x256xi1>
    %176 = vector.broadcast %175 : vector<1x256xi1> to vector<8x256xi1>
    %177 = vector.broadcast %174 : f32 to vector<8x256xf32>
    %178 = arith.select %176, %173, %177 : vector<8x256xi1>, vector<8x256xf32>
    %c0_84 = arith.constant 0 : index
    %c0_85 = arith.constant 0 : index
    %c234 = arith.constant 234 : index
    %179 = vector.load %arg1[%c0_84, %c0_85, %c234] : memref<1x8x544xf32, #tpu.memory_space<vmem>>, vector<1x8x256xf32>
    %180 = vector.shape_cast %179 : vector<1x8x256xf32> to vector<8x256xf32>
    %c0_i32_86 = arith.constant 0 : i32
    %181 = arith.sitofp %c0_i32_86 : i32 to f32
    %182 = vector.shape_cast %144 : vector<1x256xi1> to vector<1x256xi1>
    %183 = vector.broadcast %182 : vector<1x256xi1> to vector<8x256xi1>
    %184 = vector.broadcast %181 : f32 to vector<8x256xf32>
    %185 = arith.select %183, %180, %184 : vector<8x256xi1>, vector<8x256xf32>
    %c0_87 = arith.constant 0 : index
    %c0_88 = arith.constant 0 : index
    %c240 = arith.constant 240 : index
    %186 = vector.load %arg1[%c0_87, %c0_88, %c240] : memref<1x8x544xf32, #tpu.memory_space<vmem>>, vector<1x8x256xf32>
    %187 = vector.shape_cast %186 : vector<1x8x256xf32> to vector<8x256xf32>
    %c0_89 = arith.constant 0 : index
    %c0_90 = arith.constant 0 : index
    %c246 = arith.constant 246 : index
    %188 = vector.load %arg1[%c0_89, %c0_90, %c246] : memref<1x8x544xf32, #tpu.memory_space<vmem>>, vector<1x8x256xf32>
    %189 = vector.shape_cast %188 : vector<1x8x256xf32> to vector<8x256xf32>
    %c0_i32_91 = arith.constant 0 : i32
    %190 = arith.sitofp %c0_i32_91 : i32 to f32
    %191 = vector.shape_cast %146 : vector<1x256xi1> to vector<1x256xi1>
    %192 = vector.broadcast %191 : vector<1x256xi1> to vector<8x256xi1>
    %193 = vector.broadcast %190 : f32 to vector<8x256xf32>
    %194 = arith.select %192, %189, %193 : vector<8x256xi1>, vector<8x256xf32>
    %195 = tpu.concatenate %153, %155, %162, %169, %171, %178, %185, %187, %194 in 0 : vector<8x256xf32>, vector<8x256xf32>, vector<8x256xf32>, vector<8x256xf32>, vector<8x256xf32>, vector<8x256xf32>, vector<8x256xf32>, vector<8x256xf32>, vector<8x256xf32> -> vector<72x256xf32>
    %c2 = arith.constant 2 : index
    %c0_92 = arith.constant 0 : index
    %c0_93 = arith.constant 0 : index
    %196 = vector.load %arg2[%c2, %c0_92, %c0_93] : memref<4x8x72xf32, #tpu.memory_space<vmem>>, vector<1x8x72xf32>
    %197 = vector.shape_cast %196 : vector<1x8x72xf32> to vector<8x72xf32>
    %cst_94 = arith.constant dense<0.000000e+00> : vector<8x256xf32>
    %198 = tpu.matmul %197, %195, %cst_94 {dimension_numbers = #tpu.dot_dimension_numbers<[1], [0], [0], [1], [0, 0, 1, 1], [], []>} : vector<8x72xf32>, vector<72x256xf32>, vector<8x256xf32> -> vector<8x256xf32>
    %c2_95 = arith.constant 2 : index
    %c0_96 = arith.constant 0 : index
    %c0_97 = arith.constant 0 : index
    %199 = vector.load %arg3[%c2_95, %c0_96, %c0_97] : memref<4x8x1xf32, #tpu.memory_space<vmem>>, vector<1x8x1xf32>
    %200 = vector.shape_cast %199 : vector<1x8x1xf32> to vector<8x1xf32>
    %201 = vector.broadcast %200 : vector<8x1xf32> to vector<8x256xf32>
    %202 = arith.addf %198, %201 : vector<8x256xf32>
    %c1_98 = arith.constant 1 : index
    %c0_99 = arith.constant 0 : index
    %c0_100 = arith.constant 0 : index
    %203 = vector.load %arg8[%c1_98, %c0_99, %c0_100] : memref<3x8x256xf32, #tpu.memory_space<vmem>>, vector<1x8x256xf32>
    %204 = vector.shape_cast %203 : vector<1x8x256xf32> to vector<8x256xf32>
    %205 = vector.shape_cast %202 : vector<8x256xf32> to vector<1x8x256xf32>
    tpu.vector_store %arg8[%c1_98, %c0_99, %c0_100], %205 {strides = array<i32>} : memref<3x8x256xf32, #tpu.memory_space<vmem>>, vector<1x8x256xf32>,
    %206 = arith.addf %142, %202 : vector<8x256xf32>
    %c8_i32 = arith.constant 8 : i32
    %207 = vector.broadcast %c8_i32 : i32 to vector<1x256xi32>
    %208 = arith.cmpi sge, %16, %207 : vector<1x256xi32>
    %c8_i32_101 = arith.constant 8 : i32
    %209 = vector.broadcast %c8_i32_101 : i32 to vector<1x256xi32>
    %210 = arith.cmpi slt, %16, %209 : vector<1x256xi32>
    %c0_102 = arith.constant 0 : index
    %c0_103 = arith.constant 0 : index
    %c8 = arith.constant 8 : index
    %211 = vector.load %arg1[%c0_102, %c0_103, %c8] : memref<1x8x544xf32, #tpu.memory_space<vmem>>, vector<1x8x256xf32>
    %212 = vector.shape_cast %211 : vector<1x8x256xf32> to vector<8x256xf32>
    %c0_i32_104 = arith.constant 0 : i32
    %213 = arith.sitofp %c0_i32_104 : i32 to f32
    %214 = vector.shape_cast %208 : vector<1x256xi1> to vector<1x256xi1>
    %215 = vector.broadcast %214 : vector<1x256xi1> to vector<8x256xi1>
    %216 = vector.broadcast %213 : f32 to vector<8x256xf32>
    %217 = arith.select %215, %212, %216 : vector<8x256xi1>, vector<8x256xf32>
    %c0_105 = arith.constant 0 : index
    %c0_106 = arith.constant 0 : index
    %c16 = arith.constant 16 : index
    %218 = vector.load %arg1[%c0_105, %c0_106, %c16] : memref<1x8x544xf32, #tpu.memory_space<vmem>>, vector<1x8x256xf32>
    %219 = vector.shape_cast %218 : vector<1x8x256xf32> to vector<8x256xf32>
    %c0_107 = arith.constant 0 : index
    %c0_108 = arith.constant 0 : index
    %c24 = arith.constant 24 : index
    %220 = vector.load %arg1[%c0_107, %c0_108, %c24] : memref<1x8x544xf32, #tpu.memory_space<vmem>>, vector<1x8x256xf32>
    %221 = vector.shape_cast %220 : vector<1x8x256xf32> to vector<8x256xf32>
    %c0_i32_109 = arith.constant 0 : i32
    %222 = arith.sitofp %c0_i32_109 : i32 to f32
    %223 = vector.shape_cast %210 : vector<1x256xi1> to vector<1x256xi1>
    %224 = vector.broadcast %223 : vector<1x256xi1> to vector<8x256xi1>
    %225 = vector.broadcast %222 : f32 to vector<8x256xf32>
    %226 = arith.select %224, %221, %225 : vector<8x256xi1>, vector<8x256xf32>
    %c0_110 = arith.constant 0 : index
    %c0_111 = arith.constant 0 : index
    %c136 = arith.constant 136 : index
    %227 = vector.load %arg1[%c0_110, %c0_111, %c136] : memref<1x8x544xf32, #tpu.memory_space<vmem>>, vector<1x8x256xf32>
    %228 = vector.shape_cast %227 : vector<1x8x256xf32> to vector<8x256xf32>
    %c0_i32_112 = arith.constant 0 : i32
    %229 = arith.sitofp %c0_i32_112 : i32 to f32
    %230 = vector.shape_cast %208 : vector<1x256xi1> to vector<1x256xi1>
    %231 = vector.broadcast %230 : vector<1x256xi1> to vector<8x256xi1>
    %232 = vector.broadcast %229 : f32 to vector<8x256xf32>
    %233 = arith.select %231, %228, %232 : vector<8x256xi1>, vector<8x256xf32>
    %c0_113 = arith.constant 0 : index
    %c0_114 = arith.constant 0 : index
    %c144_115 = arith.constant 144 : index
    %234 = vector.load %arg1[%c0_113, %c0_114, %c144_115] : memref<1x8x544xf32, #tpu.memory_space<vmem>>, vector<1x8x256xf32>
    %235 = vector.shape_cast %234 : vector<1x8x256xf32> to vector<8x256xf32>
    %c0_116 = arith.constant 0 : index
    %c0_117 = arith.constant 0 : index
    %c152 = arith.constant 152 : index
    %236 = vector.load %arg1[%c0_116, %c0_117, %c152] : memref<1x8x544xf32, #tpu.memory_space<vmem>>, vector<1x8x256xf32>
    %237 = vector.shape_cast %236 : vector<1x8x256xf32> to vector<8x256xf32>
    %c0_i32_118 = arith.constant 0 : i32
    %238 = arith.sitofp %c0_i32_118 : i32 to f32
    %239 = vector.shape_cast %210 : vector<1x256xi1> to vector<1x256xi1>
    %240 = vector.broadcast %239 : vector<1x256xi1> to vector<8x256xi1>
    %241 = vector.broadcast %238 : f32 to vector<8x256xf32>
    %242 = arith.select %240, %237, %241 : vector<8x256xi1>, vector<8x256xf32>
    %c0_119 = arith.constant 0 : index
    %c0_120 = arith.constant 0 : index
    %c264 = arith.constant 264 : index
    %243 = vector.load %arg1[%c0_119, %c0_120, %c264] : memref<1x8x544xf32, #tpu.memory_space<vmem>>, vector<1x8x256xf32>
    %244 = vector.shape_cast %243 : vector<1x8x256xf32> to vector<8x256xf32>
    %c0_i32_121 = arith.constant 0 : i32
    %245 = arith.sitofp %c0_i32_121 : i32 to f32
    %246 = vector.shape_cast %208 : vector<1x256xi1> to vector<1x256xi1>
    %247 = vector.broadcast %246 : vector<1x256xi1> to vector<8x256xi1>
    %248 = vector.broadcast %245 : f32 to vector<8x256xf32>
    %249 = arith.select %247, %244, %248 : vector<8x256xi1>, vector<8x256xf32>
    %c0_122 = arith.constant 0 : index
    %c0_123 = arith.constant 0 : index
    %c272 = arith.constant 272 : index
    %250 = vector.load %arg1[%c0_122, %c0_123, %c272] : memref<1x8x544xf32, #tpu.memory_space<vmem>>, vector<1x8x256xf32>
    %251 = vector.shape_cast %250 : vector<1x8x256xf32> to vector<8x256xf32>
    %c0_124 = arith.constant 0 : index
    %c0_125 = arith.constant 0 : index
    %c280 = arith.constant 280 : index
    %252 = vector.load %arg1[%c0_124, %c0_125, %c280] : memref<1x8x544xf32, #tpu.memory_space<vmem>>, vector<1x8x256xf32>
    %253 = vector.shape_cast %252 : vector<1x8x256xf32> to vector<8x256xf32>
    %c0_i32_126 = arith.constant 0 : i32
    %254 = arith.sitofp %c0_i32_126 : i32 to f32
    %255 = vector.shape_cast %210 : vector<1x256xi1> to vector<1x256xi1>
    %256 = vector.broadcast %255 : vector<1x256xi1> to vector<8x256xi1>
    %257 = vector.broadcast %254 : f32 to vector<8x256xf32>
    %258 = arith.select %256, %253, %257 : vector<8x256xi1>, vector<8x256xf32>
    %259 = tpu.concatenate %217, %219, %226, %233, %235, %242, %249, %251, %258 in 0 : vector<8x256xf32>, vector<8x256xf32>, vector<8x256xf32>, vector<8x256xf32>, vector<8x256xf32>, vector<8x256xf32>, vector<8x256xf32>, vector<8x256xf32>, vector<8x256xf32> -> vector<72x256xf32>
    %c3 = arith.constant 3 : index
    %c0_127 = arith.constant 0 : index
    %c0_128 = arith.constant 0 : index
    %260 = vector.load %arg2[%c3, %c0_127, %c0_128] : memref<4x8x72xf32, #tpu.memory_space<vmem>>, vector<1x8x72xf32>
    %261 = vector.shape_cast %260 : vector<1x8x72xf32> to vector<8x72xf32>
    %cst_129 = arith.constant dense<0.000000e+00> : vector<8x256xf32>
    %262 = tpu.matmul %261, %259, %cst_129 {dimension_numbers = #tpu.dot_dimension_numbers<[1], [0], [0], [1], [0, 0, 1, 1], [], []>} : vector<8x72xf32>, vector<72x256xf32>, vector<8x256xf32> -> vector<8x256xf32>
    %c3_130 = arith.constant 3 : index
    %c0_131 = arith.constant 0 : index
    %c0_132 = arith.constant 0 : index
    %263 = vector.load %arg3[%c3_130, %c0_131, %c0_132] : memref<4x8x1xf32, #tpu.memory_space<vmem>>, vector<1x8x1xf32>
    %264 = vector.shape_cast %263 : vector<1x8x1xf32> to vector<8x1xf32>
    %265 = vector.broadcast %264 : vector<8x1xf32> to vector<8x256xf32>
    %266 = arith.addf %262, %265 : vector<8x256xf32>
    %c2_133 = arith.constant 2 : index
    %c0_134 = arith.constant 0 : index
    %c0_135 = arith.constant 0 : index
    %267 = vector.load %arg8[%c2_133, %c0_134, %c0_135] : memref<3x8x256xf32, #tpu.memory_space<vmem>>, vector<1x8x256xf32>
    %268 = vector.shape_cast %267 : vector<1x8x256xf32> to vector<8x256xf32>
    %269 = vector.shape_cast %266 : vector<8x256xf32> to vector<1x8x256xf32>
    tpu.vector_store %arg8[%c2_133, %c0_134, %c0_135], %269 {strides = array<i32>} : memref<3x8x256xf32, #tpu.memory_space<vmem>>, vector<1x8x256xf32>,
    %270 = arith.addf %206, %266 : vector<8x256xf32>
    %cst_136 = arith.constant dense<0.000000e+00> : vector<8xf32>
    %271 = vector.multi_reduction <add>, %270, %cst_136 [1] : vector<8x256xf32> to vector<8xf32>
    %272 = vector.shape_cast %271 : vector<8xf32> to vector<8x1xf32>
    %cst_137 = arith.constant 3.906250e-03 : f32
    %273 = vector.broadcast %cst_137 : f32 to vector<8x1xf32>
    %274 = arith.mulf %272, %273 : vector<8x1xf32>
    %c0_138 = arith.constant 0 : index
    %c0_139 = arith.constant 0 : index
    %275 = vector.load %arg4[%c0_138, %c0_139] : memref<16x8xf32, #tpu.memory_space<vmem>>, vector<16x8xf32>
    %cst_140 = arith.constant dense<0.000000e+00> : vector<16x1xf32>
    %276 = tpu.matmul %275, %274, %cst_140 {dimension_numbers = #tpu.dot_dimension_numbers<[1], [0], [0], [1], [0, 0, 1, 1], [], []>} : vector<16x8xf32>, vector<8x1xf32>, vector<16x1xf32> -> vector<16x1xf32>
    %c0_141 = arith.constant 0 : index
    %c0_142 = arith.constant 0 : index
    %277 = vector.load %arg5[%c0_141, %c0_142] : memref<16x1xf32, #tpu.memory_space<vmem>>, vector<16x1xf32>
    %278 = arith.addf %276, %277 : vector<16x1xf32>
    %cst_143 = arith.constant 0.000000e+00 : f32
    %279 = vector.broadcast %cst_143 : f32 to vector<16x1xf32>
    %280 = arith.maximumf %278, %279 : vector<16x1xf32>
    %cst_144 = arith.constant 0.000000e+00 : f32
    %281 = vector.broadcast %cst_144 : f32 to vector<8x256xf32>
    %c0_145 = arith.constant 0 : index
    %c0_146 = arith.constant 0 : index
    %c0_147 = arith.constant 0 : index
    %282 = vector.load %arg6[%c0_145, %c0_146, %c0_147] : memref<4x8x16xf32, #tpu.memory_space<vmem>>, vector<1x8x16xf32>
    %283 = vector.shape_cast %282 : vector<1x8x16xf32> to vector<8x16xf32>
    %cst_148 = arith.constant dense<0.000000e+00> : vector<8x1xf32>
    %284 = tpu.matmul %283, %280, %cst_148 {dimension_numbers = #tpu.dot_dimension_numbers<[1], [0], [0], [1], [0, 0, 1, 1], [], []>} : vector<8x16xf32>, vector<16x1xf32>, vector<8x1xf32> -> vector<8x1xf32>
    %cst_149 = arith.constant dense<0xFF800000> : vector<1xf32>
    %285 = vector.multi_reduction <maximumf>, %284, %cst_149 [0] : vector<8x1xf32> to vector<1xf32>
    %286 = vector.shape_cast %285 : vector<1xf32> to vector<1x1xf32>
    %287 = vector.broadcast %286 : vector<1x1xf32> to vector<8x1xf32>
    %288 = arith.subf %284, %287 : vector<8x1xf32>
    %289 = math.exp %288 : vector<8x1xf32>
    %cst_150 = arith.constant dense<0.000000e+00> : vector<1xf32>
    %290 = vector.multi_reduction <add>, %289, %cst_150 [0] : vector<8x1xf32> to vector<1xf32>
    %291 = vector.shape_cast %290 : vector<1xf32> to vector<1x1xf32>
    %292 = vector.broadcast %291 : vector<1x1xf32> to vector<8x1xf32>
    %293 = arith.divf %289, %292 : vector<8x1xf32>
    %294 = vector.broadcast %293 : vector<8x1xf32> to vector<8x256xf32>
    %295 = arith.mulf %270, %294 : vector<8x256xf32>
    %296 = arith.addf %281, %295 : vector<8x256xf32>
    %c1_151 = arith.constant 1 : index
    %c0_152 = arith.constant 0 : index
    %c0_153 = arith.constant 0 : index
    %297 = vector.load %arg6[%c1_151, %c0_152, %c0_153] : memref<4x8x16xf32, #tpu.memory_space<vmem>>, vector<1x8x16xf32>
    %298 = vector.shape_cast %297 : vector<1x8x16xf32> to vector<8x16xf32>
    %cst_154 = arith.constant dense<0.000000e+00> : vector<8x1xf32>
    %299 = tpu.matmul %298, %280, %cst_154 {dimension_numbers = #tpu.dot_dimension_numbers<[1], [0], [0], [1], [0, 0, 1, 1], [], []>} : vector<8x16xf32>, vector<16x1xf32>, vector<8x1xf32> -> vector<8x1xf32>
    %cst_155 = arith.constant dense<0xFF800000> : vector<1xf32>
    %300 = vector.multi_reduction <maximumf>, %299, %cst_155 [0] : vector<8x1xf32> to vector<1xf32>
    %301 = vector.shape_cast %300 : vector<1xf32> to vector<1x1xf32>
    %302 = vector.broadcast %301 : vector<1x1xf32> to vector<8x1xf32>
    %303 = arith.subf %299, %302 : vector<8x1xf32>
    %304 = math.exp %303 : vector<8x1xf32>
    %cst_156 = arith.constant dense<0.000000e+00> : vector<1xf32>
    %305 = vector.multi_reduction <add>, %304, %cst_156 [0] : vector<8x1xf32> to vector<1xf32>
    %306 = vector.shape_cast %305 : vector<1xf32> to vector<1x1xf32>
    %307 = vector.broadcast %306 : vector<1x1xf32> to vector<8x1xf32>
    %308 = arith.divf %304, %307 : vector<8x1xf32>
    %c0_157 = arith.constant 0 : index
    %c0_158 = arith.constant 0 : index
    %c0_159 = arith.constant 0 : index
    %309 = vector.load %arg8[%c0_157, %c0_158, %c0_159] : memref<3x8x256xf32, #tpu.memory_space<vmem>>, vector<1x8x256xf32>
    %310 = vector.shape_cast %309 : vector<1x8x256xf32> to vector<8x256xf32>
    %311 = vector.broadcast %308 : vector<8x1xf32> to vector<8x256xf32>
    %312 = arith.mulf %310, %311 : vector<8x256xf32>
    %313 = arith.addf %296, %312 : vector<8x256xf32>
    %c2_160 = arith.constant 2 : index
    %c0_161 = arith.constant 0 : index
    %c0_162 = arith.constant 0 : index
    %314 = vector.load %arg6[%c2_160, %c0_161, %c0_162] : memref<4x8x16xf32, #tpu.memory_space<vmem>>, vector<1x8x16xf32>
    %315 = vector.shape_cast %314 : vector<1x8x16xf32> to vector<8x16xf32>
    %cst_163 = arith.constant dense<0.000000e+00> : vector<8x1xf32>
    %316 = tpu.matmul %315, %280, %cst_163 {dimension_numbers = #tpu.dot_dimension_numbers<[1], [0], [0], [1], [0, 0, 1, 1], [], []>} : vector<8x16xf32>, vector<16x1xf32>, vector<8x1xf32> -> vector<8x1xf32>
    %cst_164 = arith.constant dense<0xFF800000> : vector<1xf32>
    %317 = vector.multi_reduction <maximumf>, %316, %cst_164 [0] : vector<8x1xf32> to vector<1xf32>
    %318 = vector.shape_cast %317 : vector<1xf32> to vector<1x1xf32>
    %319 = vector.broadcast %318 : vector<1x1xf32> to vector<8x1xf32>
    %320 = arith.subf %316, %319 : vector<8x1xf32>
    %321 = math.exp %320 : vector<8x1xf32>
    %cst_165 = arith.constant dense<0.000000e+00> : vector<1xf32>
    %322 = vector.multi_reduction <add>, %321, %cst_165 [0] : vector<8x1xf32> to vector<1xf32>
    %323 = vector.shape_cast %322 : vector<1xf32> to vector<1x1xf32>
    %324 = vector.broadcast %323 : vector<1x1xf32> to vector<8x1xf32>
    %325 = arith.divf %321, %324 : vector<8x1xf32>
    %c1_166 = arith.constant 1 : index
    %c0_167 = arith.constant 0 : index
    %c0_168 = arith.constant 0 : index
    %326 = vector.load %arg8[%c1_166, %c0_167, %c0_168] : memref<3x8x256xf32, #tpu.memory_space<vmem>>, vector<1x8x256xf32>
    %327 = vector.shape_cast %326 : vector<1x8x256xf32> to vector<8x256xf32>
    %328 = vector.broadcast %325 : vector<8x1xf32> to vector<8x256xf32>
    %329 = arith.mulf %327, %328 : vector<8x256xf32>
    %330 = arith.addf %313, %329 : vector<8x256xf32>
    %c3_169 = arith.constant 3 : index
    %c0_170 = arith.constant 0 : index
    %c0_171 = arith.constant 0 : index
    %331 = vector.load %arg6[%c3_169, %c0_170, %c0_171] : memref<4x8x16xf32, #tpu.memory_space<vmem>>, vector<1x8x16xf32>
    %332 = vector.shape_cast %331 : vector<1x8x16xf32> to vector<8x16xf32>
    %cst_172 = arith.constant dense<0.000000e+00> : vector<8x1xf32>
    %333 = tpu.matmul %332, %280, %cst_172 {dimension_numbers = #tpu.dot_dimension_numbers<[1], [0], [0], [1], [0, 0, 1, 1], [], []>} : vector<8x16xf32>, vector<16x1xf32>, vector<8x1xf32> -> vector<8x1xf32>
    %cst_173 = arith.constant dense<0xFF800000> : vector<1xf32>
    %334 = vector.multi_reduction <maximumf>, %333, %cst_173 [0] : vector<8x1xf32> to vector<1xf32>
    %335 = vector.shape_cast %334 : vector<1xf32> to vector<1x1xf32>
    %336 = vector.broadcast %335 : vector<1x1xf32> to vector<8x1xf32>
    %337 = arith.subf %333, %336 : vector<8x1xf32>
    %338 = math.exp %337 : vector<8x1xf32>
    %cst_174 = arith.constant dense<0.000000e+00> : vector<1xf32>
    %339 = vector.multi_reduction <add>, %338, %cst_174 [0] : vector<8x1xf32> to vector<1xf32>
    %340 = vector.shape_cast %339 : vector<1xf32> to vector<1x1xf32>
    %341 = vector.broadcast %340 : vector<1x1xf32> to vector<8x1xf32>
    %342 = arith.divf %338, %341 : vector<8x1xf32>
    %c2_175 = arith.constant 2 : index
    %c0_176 = arith.constant 0 : index
    %c0_177 = arith.constant 0 : index
    %343 = vector.load %arg8[%c2_175, %c0_176, %c0_177] : memref<3x8x256xf32, #tpu.memory_space<vmem>>, vector<1x8x256xf32>
    %344 = vector.shape_cast %343 : vector<1x8x256xf32> to vector<8x256xf32>
    %345 = vector.broadcast %342 : vector<8x1xf32> to vector<8x256xf32>
    %346 = arith.mulf %344, %345 : vector<8x256xf32>
    %347 = arith.addf %330, %346 : vector<8x256xf32>
    %c0_178 = arith.constant 0 : index
    %c0_179 = arith.constant 0 : index
    %c0_180 = arith.constant 0 : index
    %348 = vector.load %arg7[%c0_178, %c0_179, %c0_180] : memref<1x8x256xf32, #tpu.memory_space<vmem>>, vector<1x8x256xf32>
    %349 = vector.shape_cast %348 : vector<1x8x256xf32> to vector<8x256xf32>
    %350 = vector.shape_cast %347 : vector<8x256xf32> to vector<1x8x256xf32>
    tpu.vector_store %arg7[%c0_178, %c0_179, %c0_180], %350 {strides = array<i32>} : memref<1x8x256xf32, #tpu.memory_space<vmem>>, vector<1x8x256xf32>,
    return
  }
  func.func @transform_0(%arg0: i32) -> (i32, i32, i32) {
    %c0_i32 = arith.constant 0 : i32
    %c0_i32_0 = arith.constant 0 : i32
    %c0_i32_1 = arith.constant 0 : i32
    return %arg0, %c0_i32, %c0_i32_0 : i32, i32, i32
  }
  func.func @transform_1(%arg0: i32) -> (i32, i32, i32) {
    %c0_i32 = arith.constant 0 : i32
    %c0_i32_0 = arith.constant 0 : i32
    %c0_i32_1 = arith.constant 0 : i32
    %c0_i32_2 = arith.constant 0 : i32
    return %c0_i32, %c0_i32_0, %c0_i32_1 : i32, i32, i32
  }
  func.func @transform_2(%arg0: i32) -> (i32, i32, i32) {
    %c0_i32 = arith.constant 0 : i32
    %c0_i32_0 = arith.constant 0 : i32
    %c0_i32_1 = arith.constant 0 : i32
    %c0_i32_2 = arith.constant 0 : i32
    return %c0_i32, %c0_i32_0, %c0_i32_1 : i32, i32, i32
  }
  func.func @transform_3(%arg0: i32) -> (i32, i32) {
    %c0_i32 = arith.constant 0 : i32
    %c0_i32_0 = arith.constant 0 : i32
    %c0_i32_1 = arith.constant 0 : i32
    return %c0_i32, %c0_i32_0 : i32, i32
  }
  func.func @transform_4(%arg0: i32) -> (i32, i32) {
    %c0_i32 = arith.constant 0 : i32
    %c0_i32_0 = arith.constant 0 : i32
    %c0_i32_1 = arith.constant 0 : i32
    return %c0_i32, %c0_i32_0 : i32, i32
  }
  func.func @transform_5(%arg0: i32) -> (i32, i32, i32) {
    %c0_i32 = arith.constant 0 : i32
    %c0_i32_0 = arith.constant 0 : i32
    %c0_i32_1 = arith.constant 0 : i32
    %c0_i32_2 = arith.constant 0 : i32
    return %c0_i32, %c0_i32_0, %c0_i32_1 : i32, i32, i32
  }
  func.func @transform_6(%arg0: i32) -> (i32, i32, i32) {
    %c0_i32 = arith.constant 0 : i32
    %c0_i32_0 = arith.constant 0 : i32
    %c0_i32_1 = arith.constant 0 : i32
    return %arg0, %c0_i32, %c0_i32_0 : i32, i32, i32
  }
}

</mosaic_0001>

<bundles_post_ra>
// kernel: skm_pallas.1
= control target key start
LH: loop header
LB: loop body
LE: loop exit
PB: predicated region body
PF: predicated region fallthrough
CT: control target
= control target key end

     0   :  { %s1879_s21 = smov 0   ;;  %s2331_s0 = inlined_call_operand.vmem [shape: f32[2,8,544], index: 0, kind: input, shape index: {}]   ;;  %s2332_s1 = inlined_call_operand.vmem [shape: f32[4,8,72], index: 1, kind: input, shape index: {}]   ;;  %s2333_s2 = inlined_call_operand.vmem [shape: f32[4,8,1], index: 2, kind: input, shape index: {}]   ;;  %s2334_s3 = inlined_call_operand.vmem [shape: f32[16,8], index: 3, kind: input, shape index: {}]   ;;  %s2335_s4 = inlined_call_operand.vmem [shape: f32[16,1], index: 4, kind: input, shape index: {}]   ;;  %s2336_s5 = inlined_call_operand.vmem [shape: f32[4,8,16], index: 5, kind: input, shape index: {}]   ;;  %s2337_s6 = inlined_call_operand.vmem [shape: f32[2,8,256], index: 6, kind: output, shape index: {}]  }
   0x1 LB: > { %s1633_s22 = sadd.s32 4294967295, %s1817_s21   ;;  %p1637_p0 = scmp.ge.s32.totalorder %s1817_s21, 1  ;;  %s1817_s21 = sphi %s1879_s21, %s16_s21  }
   0x2   : > { %p212_p1 = scmp.lt.s32.totalorder %s1817_s21, 3 }
   0x4   : > { %p213_p2 = pnand %p1637_p0, %p212_p1 }
   0x5   : > { %p242_p3 = scmp.lt.s32.totalorder (!%p213_p2), %s1633_s22, 1  ;;  %s1819_s27 = smov (!%p213_p2), 78  }
   0x6   : > { %216 = sbr.rel (%p213_p2) target bundleno = 1243 (0x4db), region = 44  ;;  %s1820_s28 = smov (!%p213_p2), 80  }
   0x7   : > { %s1821_s29 = smov (!%p213_p2), 44   ;;  %s1822_s30 = smov (!%p213_p2), 82  }
   0x8   : > { %s1823_s7 = smov (!%p213_p2), 48   ;;  %s1824_s8 = smov (!%p213_p2), 110  }
   0x9   : > { %s1825_s9 = smov (!%p213_p2), 52   ;;  %s1826_s10 = smov (!%p213_p2), 112  }
   0xa   : > { %s1827_s11 = smov (!%p213_p2), 108   ;;  %s1828_s12 = smov (!%p213_p2), 114  }
   0xb   : > { %s2339_s22 = smov (!%p242_p3, %s1633_s22), 1  ;;  %s1829_s13 = smov 14   ;;  %v1833_v4 = vmov 0.0   ;;  %v252_v6 = vlaneseq  ;;  %vm370_vm1 = vcmask 637952   ;;  %vm405_vm3 = vcmask 654336   ;;  %v411_v62 = vld [vmem:[%s2333_s2] sm:$0xff] }
   0xc   : > { %s1759_s23 = smul.u32 40, %s2339_s22  ;;  %s1830_s14 = smov 116   ;;  %485 = vmatprep.mubr.f32.mxu0 %v1833_v4  ;;  %661 = vmatprep.mubr.f32.mxu1 %v1833_v4  ;;  %vm525_vm4 = vcmask 359424   ;;  %vm357_vm7 = vcmask 670720   ;;  %vm576_vm9 = vcmask 392192   ;;  %vm344_vm11 = vcmask 900096  }
   0xd   : > { %s1831_s15 = smov 16   ;;  %s1832_s16 = smov 18   ;;  %v253_v7 = vand.u32 127, %v252_v6  ;;  %vm508_vm12 = vcmask 424960   ;;  %vm394_vm15 = vcmask 916480   ;;  %v1841_v54 = vmov 0  }
   0xe   : > { %s1893_s26 = scalar_lea.vmem %s2331_s0, %s1759_s23  ;;  %s1834_s17 = smov 10   ;;  %1794 = vset.pattern.permute.xlu0 %v1841_v54  ;;  %1793 = vset.pattern.permute.xlu1 %v1841_v54 }
   0xf   : > { %v1896_v0 = vld [vmem:[%s1893_s26 + $0x10] sm:$0xff]  ;;  %v1899_v1 = vld [vmem:[%s1893_s26 + $0x8] sm:$0xff]  ;;  %v1904_v2 = vld [vmem:[%s1893_s26 + $0x18] sm:$0xff]  ;;  %s1835_s18 = smov 104   ;;  %s1836_s19 = smov 22   ;;  %v254_v8 = vadd.s32 128, %v253_v7 }
  0x10   : > { %366 = vrot.lane.b32.xlu0 %v1896_v0, %s1819_s27  ;;  %364 = vrot.lane.b32.xlu1 %v1899_v1, %s1819_s27  ;;  %v1954_v3 = vld [vmem:[%s1893_s26] sm:$0xff]  ;;  %v1991_v12 = vand.u32 15, %v253_v7  ;;  %s1837_s20 = smov 106   ;;  %s1838_s23 = smov 120  }
  0x11   : > { %v946_v5 = vld [vmem:[%s1893_s26 + $0x20] sm:$0xff]  ;;  %v1989_v9 = vand.u32 15, %v254_v8  ;;  %s1839_s24 = smov 118   ;;  %s1840_s25 = smov 74   ;;  %v1685_v8 = vld [vmem:[%s2333_s2 + $0x18] sm:$0xff] }
  0x12   : > { %vm281_vm2 = vcmp.lt.s32.totalorder %v1991_v12, 14  ;;  %vm496_vm6 = vcmp.lt.s32.totalorder %v1991_v12, 12  ;;  %vm279_vm10 = vcmp.ge.s32.totalorder %v1991_v12, 2  ;;  %vm494_vm14 = vcmp.ge.s32.totalorder %v1991_v12, 4  ;;  %s1842_s26 = smov 86  }
  0x13   : > { %vm282_vm0 = vcmp.lt.s32.totalorder %v1989_v9, 14  ;;  %vm497_vm5 = vcmp.lt.s32.totalorder %v1989_v9, 12  ;;  %vm280_vm8 = vcmp.ge.s32.totalorder %v1989_v9, 2  ;;  %vm495_vm13 = vcmp.ge.s32.totalorder %v1989_v9, 4 }
  0x14   : > { %368 = vrot.lane.b32.xlu0 %v1904_v2, %s1819_s27  ;;  %401 = vrot.lane.b32.xlu1 %v1896_v0, %s1820_s28 }
  0x18   : > { %403 = vrot.lane.b32.xlu0 %v1904_v2, %s1820_s28  ;;  %523 = vrot.lane.b32.xlu1 %v1896_v0, %s1821_s29 }
  0x1c   : > { %564 = vrot.lane.b32.xlu0 %v1904_v2, %s1821_s29  ;;  %399 = vrot.lane.b32.xlu1 %v1899_v1, %s1820_s28 }
  0x20   : > { %521 = vrot.lane.b32.xlu0 %v1899_v1, %s1821_s29  ;;  %353 = vrot.lane.b32.xlu1 %v1896_v0, %s1822_s30 }
  0x24   : > { %355 = vrot.lane.b32.xlu0 %v1904_v2, %s1822_s30  ;;  %574 = vrot.lane.b32.xlu1 %v1896_v0, %s1823_s7 }
  0x28   : > { %581 = vrot.lane.b32.xlu0 %v1904_v2, %s1823_s7  ;;  %351 = vrot.lane.b32.xlu1 %v1899_v1, %s1822_s30 }
  0x2c   : > { %572 = vrot.lane.b32.xlu0 %v1899_v1, %s1823_s7  ;;  %340 = vrot.lane.b32.xlu1 %v1896_v0, %s1824_s8 }
  0x30   : > { %342 = vrot.lane.b32.xlu0 %v1904_v2, %s1824_s8  ;;  %506 = vrot.lane.b32.xlu1 %v1896_v0, %s1825_s9 }
  0x34   : > { %558 = vrot.lane.b32.xlu0 %v1904_v2, %s1825_s9  ;;  %338 = vrot.lane.b32.xlu1 %v1899_v1, %s1824_s8 }
  0x38   : > { %504 = vrot.lane.b32.xlu0 %v1899_v1, %s1825_s9  ;;  %390 = vrot.lane.b32.xlu1 %v1896_v0, %s1826_s10 }
  0x3c   : > { %392 = vrot.lane.b32.xlu0 %v1904_v2, %s1826_s10  ;;  %547 = vrot.lane.b32.xlu1 %v1896_v0, %s1827_s11 }
  0x40   : > { %549 = vrot.lane.b32.xlu0 %v1904_v2, %s1827_s11  ;;  %388 = vrot.lane.b32.xlu1 %v1899_v1, %s1826_s10 }
  0x44   : > { %545 = vrot.lane.b32.xlu0 %v1899_v1, %s1827_s11  ;;  %327 = vrot.lane.b32.xlu1 %v1896_v0, %s1828_s12 }
  0x48   : > { %329 = vrot.lane.b32.xlu0 %v1904_v2, %s1828_s12  ;;  %325 = vrot.lane.b32.xlu1 %v1899_v1, %s1828_s12 }
  0x4c   : > { %312 = vrot.lane.b32.xlu0 %v1899_v1, %s1829_s13  ;;  %314 = vrot.lane.b32.xlu1 %v1896_v0, %s1829_s13 }
  0x50   : > { %534 = vrot.lane.b32.xlu0 %v1896_v0, %s1830_s14  ;;  %536 = vrot.lane.b32.xlu1 %v1904_v2, %s1830_s14 }
  0x54   : > { %532 = vrot.lane.b32.xlu1 %v1899_v1, %s1830_s14  ;;  %310 = vrot.lane.b32.xlu0 %v1954_v3, %s1829_s13  ;;  %s1710_s13 = sshll.u32 %s2339_s22, 4 }
  0x58   : > { %381 = vrot.lane.b32.xlu1 %v1896_v0, %s1831_s15  ;;  %379 = vrot.lane.b32.xlu0 %v1899_v1, %s1831_s15 }
  0x5c   : > { %519 = vrot.lane.b32.xlu1 %v1954_v3, %s1821_s29  ;;  %377 = vrot.lane.b32.xlu0 %v1954_v3, %s1831_s15 }
  0x60   : > { %297 = vrot.lane.b32.xlu1 %v1896_v0, %s1832_s16  ;;  %295 = vrot.lane.b32.xlu0 %v1899_v1, %s1832_s16 }
  0x64   : > { %570 = vrot.lane.b32.xlu1 %v1954_v3, %s1823_s7  ;;  %293 = vrot.lane.b32.xlu0 %v1954_v3, %s1832_s16  ;;  %s251_s16 = scalar_lea.vmem %s2337_s6, %s1710_s13 }
  0x68   : > { %761 = vrot.lane.b32.xlu1 %v1904_v2, %s1834_s17  ;;  %759 = vrot.lane.b32.xlu0 %v1896_v0, %s1834_s17 }
  0x6c   : > { %757 = vrot.lane.b32.xlu1 %v1899_v1, %s1834_s17  ;;  %502 = vrot.lane.b32.xlu0 %v1954_v3, %s1825_s9 }
  0x70   : > { %794 = vrot.lane.b32.xlu1 %v1904_v2, %s1831_s15  ;;  %792 = vrot.lane.b32.xlu0 %v1896_v0, %s1831_s15 }
  0x74   : > { %954 = vrot.lane.b32.xlu1 %v946_v5, %s1835_s18  ;;  %940 = vrot.lane.b32.xlu0 %v1904_v2, %s1835_s18 }
  0x78   : > { %923 = vrot.lane.b32.xlu1 %v1896_v0, %s1835_s18  ;;  %790 = vrot.lane.b32.xlu0 %v1899_v1, %s1831_s15 }
  0x7c   : > { %748 = vrot.lane.b32.xlu1 %v1904_v2, %s1836_s19  ;;  %746 = vrot.lane.b32.xlu0 %v1896_v0, %s1836_s19 }
  0x80   : > { %974 = vrot.lane.b32.xlu1 %v946_v5, %s1826_s10  ;;  %970 = vrot.lane.b32.xlu0 %v1904_v2, %s1826_s10 }
  0x82   : > { %v367_v10 = vpop.permute.xlu0 %366  ;;  %v365_v11 = vpop.permute.xlu1 %364 }
  0x83   : > { %v371_v16 = vsel %vm370_vm1, %v365_v11, %v367_v10 }
  0x84   : > { %964 = vrot.lane.b32.xlu1 %v1896_v0, %s1826_s10  ;;  %744 = vrot.lane.b32.xlu0 %v1899_v1, %s1836_s19 }
  0x86   : > { %v369_v13 = vpop.permute.xlu0 %368  ;;  %v402_v14 = vpop.permute.xlu1 %401 }
  0x87   : > { %v372_v15 = vsel %vm370_vm1, %v367_v10, %v369_v13  ;;  %vm551_vm1 = vcmask 883712  }
  0x88   : > { %1641 = vmatprep.subr.msk.mxu0 %vm282_vm0, %v372_v15  ;;  %735 = vrot.lane.b32.xlu1 %v1904_v2, %s1837_s20 }
  0x89   : > { %733 = vrot.lane.b32.xlu0 %v1896_v0, %s1837_s20  ;;  %1642 = vmatpush1.msk.msra.mxu0 %vm281_vm2, %v371_v16 }
  0x8a   : > { %v404_v17 = vpop.permute.xlu0 %403  ;;  %v524_v18 = vpop.permute.xlu1 %523 }
  0x8b   : > { %v407_v19 = vsel %vm405_vm3, %v402_v14, %v404_v17 }
  0x8c   : > { %437 = vmatprep.subr.mxu0 %v407_v19  ;;  %948 = vrot.lane.b32.xlu1 %v946_v5, %s1838_s23  ;;  %v1670_v5 = vld [vmem:[%s2333_s2 + $0x10] sm:$0xff] }
  0x8d   : > { %934 = vrot.lane.b32.xlu0 %v1904_v2, %s1838_s23 }
  0x8e   : > { %v565_v20 = vpop.permute.xlu0 %564  ;;  %v400_v21 = vpop.permute.xlu1 %399 }
  0x8f   : > { %v406_v22 = vsel %vm405_vm3, %v400_v21, %v402_v14  ;;  %v566_v23 = vsel %vm525_vm4, %v524_v18, %v565_v20 }
  0x90   : > { %438 = vmatpush1.msra.mxu0 %v406_v22  ;;  %1656 = vmatprep.subr.msk.mxu1 %vm497_vm5, %v566_v23 }
  0x91   : > { %906 = vrot.lane.b32.xlu1 %v1896_v0, %s1838_s23  ;;  %731 = vrot.lane.b32.xlu0 %v1899_v1, %s1837_s20 }
  0x92   : > { %v2017_v24 = vpop.permute.xlu0 %521  ;;  %v354_v25 = vpop.permute.xlu1 %353 }
  0x93   : > { %v2021_v26 = vsel %vm525_vm4, %v2017_v24, %v524_v18 }
  0x94   : > { %1657 = vmatpush1.msk.msra.mxu1 %vm496_vm6, %v2021_v26 }
  0x95   : > { %784 = vrot.lane.b32.xlu1 %v1904_v2, %s1826_s10  ;;  %782 = vrot.lane.b32.xlu0 %v1896_v0, %s1826_s10 }
  0x96   : > { %v356_v27 = vpop.permute.xlu0 %355  ;;  %v575_v28 = vpop.permute.xlu1 %574 }
  0x97   : > { %v359_v29 = vsel %vm357_vm7, %v354_v25, %v356_v27 }
  0x98   : > { %1643 = vmatprep.subr.msk.mxu0 %vm280_vm8, %v359_v29 }
  0x99   : > { %921 = vrot.lane.b32.xlu1 %v1899_v1, %s1835_s18  ;;  %780 = vrot.lane.b32.xlu0 %v1899_v1, %s1826_s10 }
  0x9a   : > { %v582_v30 = vpop.permute.xlu0 %581  ;;  %v352_v31 = vpop.permute.xlu1 %351 }
  0x9b   : > { %v358_v32 = vsel %vm357_vm7, %v352_v31, %v354_v25  ;;  %v583_v33 = vsel %vm576_vm9, %v575_v28, %v582_v30  ;;  %vm331_vm7 = vcmask 932864  }
  0x9c   : > { %1644 = vmatpush1.msk.msra.mxu0 %vm279_vm10, %v358_v32  ;;  %613 = vmatprep.subr.mxu1 %v583_v33 }
  0x9d   : > { %722 = vrot.lane.b32.xlu1 %v1904_v2, %s1839_s24  ;;  %720 = vrot.lane.b32.xlu0 %v1896_v0, %s1839_s24 }
  0x9e   : > { %v2043_v34 = vpop.permute.xlu0 %572  ;;  %v341_v35 = vpop.permute.xlu1 %340 }
  0x9f   : > { %v2047_v36 = vsel %vm576_vm9, %v2043_v34, %v575_v28 }
  0xa0   : > { %614 = vmatpush1.msra.mxu1 %v2047_v36 }
  0xa1   : > { %962 = vrot.lane.b32.xlu1 %v1899_v1, %s1826_s10  ;;  %718 = vrot.lane.b32.xlu0 %v1899_v1, %s1839_s24 }
  0xa2   : > { %v343_v37 = vpop.permute.xlu0 %342  ;;  %v507_v38 = vpop.permute.xlu1 %506 }
  0xa3   : > { %v346_v39 = vsel %vm344_vm11, %v341_v35, %v343_v37 }
  0xa4   : > { %1645 = vmatprep.subr.msk.mxu0 %vm282_vm0, %v346_v39 }
  0xa5   : > { %707 = vrot.lane.b32.xlu1 %v1896_v0, %s1840_s25  ;;  %705 = vrot.lane.b32.xlu0 %v1899_v1, %s1840_s25 }
  0xa6   : > { %v559_v40 = vpop.permute.xlu0 %558  ;;  %v339_v41 = vpop.permute.xlu1 %338 }
  0xa7   : > { %v560_v42 = vsel %vm508_vm12, %v507_v38, %v559_v40  ;;  %v345_v43 = vsel %vm344_vm11, %v339_v41, %v341_v35  ;;  %vm316_vm11 = vcmask 113664   ;;  %v1654_v35 = vld [vmem:[%s2332_s1 + $0x8] sm:$0xff] }
  0xa8   : > { %1646 = vmatpush1.msk.msra.mxu0 %vm281_vm2, %v345_v43  ;;  %1658 = vmatprep.subr.msk.mxu1 %vm495_vm13, %v560_v42 }
  0xa9   : > { %904 = vrot.lane.b32.xlu1 %v1899_v1, %s1838_s23  ;;  %703 = vrot.lane.b32.xlu0 %v1954_v3, %s1840_s25 }
  0xaa   : > { %v2067_v44 = vpop.permute.xlu0 %504  ;;  %v391_v45 = vpop.permute.xlu1 %390 }
  0xab   : > { %v2071_v46 = vsel %vm508_vm12, %v2067_v44, %v507_v38 }
  0xac   : > { %1659 = vmatpush1.msk.msra.mxu1 %vm494_vm14, %v2071_v46 }
  0xad   : > { %774 = vrot.lane.b32.xlu1 %v1896_v0, %s1820_s28  ;;  %772 = vrot.lane.b32.xlu0 %v1899_v1, %s1820_s28 }
  0xae   : > { %v393_v47 = vpop.permute.xlu0 %392  ;;  %v548_v48 = vpop.permute.xlu1 %547 }
  0xaf   : > { %v396_v49 = vsel %vm394_vm15, %v391_v45, %v393_v47 }
  0xb0   : > { %443 = vmatprep.subr.mxu0 %v396_v49 }
  0xb1   : > { %919 = vrot.lane.b32.xlu1 %v1954_v3, %s1835_s18  ;;  %770 = vrot.lane.b32.xlu0 %v1954_v3, %s1820_s28 }
  0xb2   : > { %v550_v50 = vpop.permute.xlu0 %549  ;;  %v389_v51 = vpop.permute.xlu1 %388 }
  0xb3   : > { %v553_v52 = vsel %vm551_vm1, %v548_v48, %v550_v50  ;;  %v395_v53 = vsel %vm394_vm15, %v389_v51, %v391_v45 }
  0xb4   : > { %444 = vmatpush1.msra.mxu0 %v395_v53  ;;  %1660 = vmatprep.subr.msk.mxu1 %vm497_vm5, %v553_v52 }
  0xb5   : > { %690 = vrot.lane.b32.xlu1 %v1896_v0, %s1842_s26  ;;  %688 = vrot.lane.b32.xlu0 %v1899_v1, %s1842_s26  ;;  %v1655_v1 = vld [vmem:[%s2333_s2 + $0x8] sm:$0xff] }
  0xb6   : > { %v546_v55 = vpop.permute.xlu0 %545  ;;  %v328_v56 = vpop.permute.xlu1 %327 }
  0xb7   : > { %v552_v57 = vsel %vm551_vm1, %v546_v55, %v548_v48  ;;  %vm538_vm1 = vcmask 949248  }
  0xb8   : > { %1661 = vmatpush1.msk.msra.mxu1 %vm496_vm6, %v552_v57 }
  0xb9   : > { %960 = vrot.lane.b32.xlu1 %v1954_v3, %s1826_s10  ;;  %686 = vrot.lane.b32.xlu0 %v1954_v3, %s1842_s26 }
  0xba   : > { %619 = vmatprep.subr.mxu1 %v396_v49  ;;  %v330_v58 = vpop.permute.xlu0 %329  ;;  %v326_v59 = vpop.permute.xlu1 %325 }
  0xbb   : > { %v333_v60 = vsel %vm331_vm7, %v328_v56, %v330_v58  ;;  %620 = vmatpush1.msra.mxu1 %v395_v53  ;;  %v332_v61 = vsel %vm331_vm7, %v326_v59, %v328_v56  ;;  %vm672_vm7 = vcmp.ge.s32.totalorder %v1991_v12, 6 }
  0xbc   : > { %1647 = vmatprep.subr.msk.mxu0 %vm280_vm8, %v333_v60 }
  0xbd   : > { %902 = vrot.lane.b32.xlu0 %v1954_v3, %s1838_s23  ;;  %1648 = vmatpush1.msk.msra.mxu0 %vm279_vm10, %v332_v61 }
  0xbe   : > { %v313_v63 = vpop.permute.xlu0 %312  ;;  %v315_v0 = vpop.permute.xlu1 %314  ;;  %414 = vperm.xlu1 %1793, %v411_v62  }
  0xbf   : > { %v318_v2 = vsel %vm316_vm11, %v313_v63, %v315_v0 }
  0xc0   : > { %1649 = vmatprep.subr.msk.mxu0 %vm282_vm0, %v318_v2  ;;  %vm383_vm0 = vcmask 130048  }
  0xc1   : > { %591 = vperm.xlu0 %1794, %v1655_v1  }
  0xc2   : > { %v535_v3 = vpop.permute.xlu0 %534  ;;  %v537_v6 = vpop.permute.xlu1 %536  ;;  %806 = vperm.xlu1 %1793, %v1670_v5  }
  0xc3   : > { %v540_v7 = vsel %vm538_vm1, %v535_v3, %v537_v6 }
  0xc4   : > { %1662 = vmatprep.subr.msk.mxu1 %vm495_vm13, %v540_v7 }
  0xc6   : > { %v533_v10 = vpop.permute.xlu1 %532  ;;  %v311_v11 = vpop.permute.xlu0 %310  ;;  %984 = vperm.xlu1 %1793, %v1685_v8  }
  0xc7   : > { %v539_v13 = vsel %vm538_vm1, %v533_v10, %v535_v3  ;;  %v317_v14 = vsel %vm316_vm11, %v311_v11, %v313_v63  ;;  %vm737_vm11 = vcmask 867328   ;;  %vm908_vm1 = vcmask 982016  }
  0xc8   : > { %1650 = vmatpush1.msk.msra.mxu0 %vm281_vm2, %v317_v14  ;;  %1663 = vmatpush1.msk.msra.mxu1 %vm494_vm14, %v539_v13  ;;  %vm299_vm2 = vcmask 146432  }
  0xc9   : > { %1664 = vmatprep.subr.msk.mxu1 %vm497_vm5, %v2021_v26  ;;  %vm763_vm5 = vcmask 80896  }
  0xca   : > { %v382_v15 = vpop.permute.xlu1 %381  ;;  %v380_v16 = vpop.permute.xlu0 %379 }
  0xcb   : > { %v385_v17 = vsel %vm383_vm0, %v380_v16, %v382_v15 }
  0xcc   : > { %449 = vmatprep.subr.mxu0 %v385_v17 }
  0xce   : > { %v520_v18 = vpop.permute.xlu1 %519  ;;  %v378_v19 = vpop.permute.xlu0 %377 }
  0xcf   : > { %v526_v20 = vsel %vm525_vm4, %v520_v18, %v2017_v24  ;;  %v384_v21 = vsel %vm383_vm0, %v378_v19, %v380_v16  ;;  %v410_v24 = vld [vmem:[%s2332_s1] sm:$0xff]  ;;  %vm417_vm4 = vcmask 588800  }
  0xd0   : > { %450 = vmatpush1.msra.mxu0 %v384_v21  ;;  %1665 = vmatpush1.msk.msra.mxu1 %vm496_vm6, %v526_v20  ;;  %vm675_vm6 = vcmp.lt.s32.totalorder %v1989_v9, 10 }
  0xd1   : > { %625 = vmatprep.subr.mxu1 %v2047_v36 }
  0xd2   : > { %v298_v22 = vpop.permute.xlu1 %297  ;;  %v296_v23 = vpop.permute.xlu0 %295 }
  0xd3   : > { %v301_v25 = vsel %vm299_vm2, %v296_v23, %v298_v22 }
  0xd4   : > { %1651 = vmatprep.subr.msk.mxu0 %vm280_vm8, %v301_v25  ;;  %vm674_vm8 = vcmp.lt.s32.totalorder %v1991_v12, 10 }
  0xd6   : > { %v571_v26 = vpop.permute.xlu1 %570  ;;  %v294_v27 = vpop.permute.xlu0 %293 }
  0xd7   : > { %v300_v28 = vsel %vm299_vm2, %v294_v27, %v296_v23  ;;  %v577_v29 = vsel %vm576_vm9, %v571_v26, %v2043_v34  ;;  %vm925_vm9 = vcmask 850944   ;;  %vm889_vm2 = vcmp.ge.s32.totalorder %v1989_v9, 8 }
  0xd8   : > { %1652 = vmatpush1.msk.msra.mxu0 %vm279_vm10, %v300_v28  ;;  %626 = vmatpush1.msra.mxu1 %v577_v29  ;;  %vm891_vm10 = vcmp.lt.s32.totalorder %v1989_v9, 8 }
  0xd9   : > { %1666 = vmatprep.subr.msk.mxu1 %vm495_vm13, %v2071_v46  ;;  %1653 = vmatmul.mubr.msk.f32.vlgmr.msra.gmra.mxu0 %vm417_vm4, %v410_v24  ;;  %vm750_vm13 = vcmask 179200  }
  0xda   : > { %v762_v30 = vpop.permute.xlu1 %761  ;;  %v760_v31 = vpop.permute.xlu0 %759  ;;  %876 = vmatprep.mubr.f32.mxu0 %v1833_v4 }
  0xdb   : > { %v765_v32 = vsel %vm763_vm5, %v760_v31, %v762_v30 }
  0xdc   : > { %1671 = vmatprep.subr.msk.mxu0 %vm675_vm6, %v765_v32 }
  0xde   : > { %v758_v33 = vpop.permute.xlu1 %757  ;;  %v503_v34 = vpop.permute.xlu0 %502 }
  0xdf   : > { %v764_v36 = vsel %vm763_vm5, %v758_v33, %v760_v31  ;;  %v509_v37 = vsel %vm508_vm12, %v503_v34, %v2067_v44  ;;  %vm890_vm12 = vcmp.lt.s32.totalorder %v1991_v12, 8  ;;  %vm888_vm5 = vcmp.ge.s32.totalorder %v1991_v12, 8 }
  0xe0   : > { %1667 = vmatpush1.msk.msra.mxu1 %vm494_vm14, %v509_v37  ;;  %1672 = vmatpush1.msk.msra.mxu0 %vm674_vm8, %v764_v36  ;;  %vm673_vm14 = vcmp.ge.s32.totalorder %v1989_v9, 6 }
  0xe1   : > { %1668 = vmatmul.mubr.msk.f32.vlgmr.msra.gmra.mxu1 %vm417_vm4, %v1654_v35 }
  0xe2   : > { %v795_v38 = vpop.permute.xlu1 %794  ;;  %v793_v39 = vpop.permute.xlu0 %792  ;;  %1054 = vmatprep.mubr.f32.mxu1 %v1833_v4 }
  0xe3   : > { %v797_v40 = vsel %vm383_vm0, %v793_v39, %v795_v38 }
  0xe4   : > { %828 = vmatprep.subr.mxu0 %v797_v40  ;;  %v1669_v40 = vld [vmem:[%s2332_s1 + $0x10] sm:$0xff] }
  0xe6   : > { %v955_v41 = vpop.permute.xlu1 %954  ;;  %v941_v42 = vpop.permute.xlu0 %940 }
  0xe7   : > { %v956_v43 = vsel %vm925_vm9, %v941_v42, %v955_v41 }
  0xe8   : > { %1686 = vmatprep.subr.msk.mxu1 %vm891_vm10, %v956_v43 }
  0xea   : > { %v924_v44 = vpop.permute.xlu1 %923  ;;  %v791_v45 = vpop.permute.xlu0 %790 }
  0xeb   : > { %v942_v46 = vsel %vm925_vm9, %v924_v44, %v941_v42  ;;  %v796_v47 = vsel %vm383_vm0, %v791_v45, %v793_v39 }
  0xec   : > { %829 = vmatpush1.msra.mxu0 %v796_v47  ;;  %1687 = vmatpush1.msk.msra.mxu1 %vm890_vm12, %v942_v46 }
  0xee   : > { %v749_v48 = vpop.permute.xlu1 %748  ;;  %v747_v49 = vpop.permute.xlu0 %746 }
  0xef   : > { %v752_v50 = vsel %vm750_vm13, %v747_v49, %v749_v48 }
  0xf0   : > { %1673 = vmatprep.subr.msk.mxu0 %vm673_vm14, %v752_v50 }
  0xf2   : > { %v975_v51 = vpop.permute.xlu1 %974  ;;  %v971_v52 = vpop.permute.xlu0 %970 }
  0xf3   : > { %v976_v53 = vsel %vm394_vm15, %v971_v52, %v975_v51 }
  0xf4   : > { %1006 = vmatprep.subr.mxu1 %v976_v53 }
  0xf6   : > { %v965_v54 = vpop.permute.xlu1 %964  ;;  %v745_v55 = vpop.permute.xlu0 %744 }
  0xf7   : > { %v972_v56 = vsel %vm394_vm15, %v965_v54, %v971_v52  ;;  %v751_v57 = vsel %vm750_vm13, %v745_v55, %v747_v49  ;;  %vm724_vm13 = vcmask 965632  }
  0xf8   : > { %1674 = vmatpush1.msk.msra.mxu0 %vm672_vm7, %v751_v57  ;;  %1007 = vmatpush1.msra.mxu1 %v972_v56 }
  0xfa   : > { %v736_v58 = vpop.permute.xlu1 %735 }
  0xfb   : > { %v734_v59 = vpop.permute.xlu0 %733 }
  0xfc   : > { %v739_v60 = vsel %vm737_vm11, %v734_v59, %v736_v58 }
  0xfd   : > { %1675 = vmatprep.subr.msk.mxu0 %vm675_vm6, %v739_v60 }
  0xfe   : > { %v949_v61 = vpop.permute.xlu1 %948 }
  0xff   : > { %v935_v62 = vpop.permute.xlu0 %934 }
 0x100   : > { %v950_v63 = vsel %vm908_vm1, %v935_v62, %v949_v61 }
 0x101   : > { %1688 = vmatprep.subr.msk.mxu1 %vm889_vm2, %v950_v63 }
 0x103   : > { %v907_v0 = vpop.permute.xlu1 %906  ;;  %v732_v1 = vpop.permute.xlu0 %731 }
 0x104   : > { %v936_v2 = vsel %vm908_vm1, %v907_v0, %v935_v62  ;;  %v738_v5 = vsel %vm737_vm11, %v732_v1, %v734_v59  ;;  %vm709_vm11 = vcmask 605184  }
 0x105   : > { %1676 = vmatpush1.msk.msra.mxu0 %vm674_vm8, %v738_v5  ;;  %1689 = vmatpush1.msk.msra.mxu1 %vm888_vm5, %v936_v2 }
 0x106   : > { %1690 = vmatprep.subr.msk.mxu1 %vm891_vm10, %v942_v46 }
 0x107   : > { %v785_v3 = vpop.permute.xlu1 %784  ;;  %v783_v6 = vpop.permute.xlu0 %782 }
 0x108   : > { %v787_v7 = vsel %vm394_vm15, %v783_v6, %v785_v3 }
 0x109   : > { %834 = vmatprep.subr.mxu0 %v787_v7 }
 0x10b   : > { %v922_v8 = vpop.permute.xlu1 %921  ;;  %v781_v10 = vpop.permute.xlu0 %780 }
 0x10c   : > { %v927_v11 = vsel %vm925_vm9, %v922_v8, %v924_v44  ;;  %v786_v13 = vsel %vm394_vm15, %v781_v10, %v783_v6  ;;  %v1684_v44 = vld [vmem:[%s2332_s1 + $0x18] sm:$0xff] }
 0x10d   : > { %835 = vmatpush1.msra.mxu0 %v786_v13  ;;  %1691 = vmatpush1.msk.msra.mxu1 %vm890_vm12, %v927_v11  ;;  %v1071_v13 = vld [vmem:[%s2334_s3 + $0x8] sm:$0xff] }
 0x10e   : > { %1012 = vmatprep.subr.mxu1 %v972_v56 }
 0x10f   : > { %v723_v14 = vpop.permute.xlu1 %722  ;;  %v721_v15 = vpop.permute.xlu0 %720 }
 0x110   : > { %v726_v16 = vsel %vm724_vm13, %v721_v15, %v723_v14  ;;  %v1073_v14 = vld [vmem:[%s2335_s4 + $0x8] sm:$0xff] }
 0x111   : > { %1677 = vmatprep.subr.msk.mxu0 %vm673_vm14, %v726_v16  ;;  %v1072_v16 = vld [vmem:[%s2335_s4] sm:$0xff] }
 0x113   : > { %v963_v17 = vpop.permute.xlu1 %962  ;;  %v719_v18 = vpop.permute.xlu0 %718 }
 0x114   : > { %v967_v19 = vsel %vm394_vm15, %v963_v17, %v965_v54  ;;  %v725_v20 = vsel %vm724_vm13, %v719_v18, %v721_v15 }
 0x115   : > { %1678 = vmatpush1.msk.msra.mxu0 %vm672_vm7, %v725_v20  ;;  %1013 = vmatpush1.msra.mxu1 %v967_v19 }
 0x116   : > { %1692 = vmatprep.subr.msk.mxu1 %vm889_vm2, %v936_v2 }
 0x117   : > { %v708_v21 = vpop.permute.xlu1 %707  ;;  %v706_v22 = vpop.permute.xlu0 %705 }
 0x118   : > { %v711_v23 = vsel %vm709_vm11, %v706_v22, %v708_v21 }
 0x119   : > { %1679 = vmatprep.subr.msk.mxu0 %vm675_vm6, %v711_v23  ;;  %vm692_vm6 = vcmask 703488   ;;  %v1702_v23 = vld [vmem:[%s2336_s5 + $0x8] sm:$0xff] }
 0x11b   : > { %v905_v25 = vpop.permute.xlu1 %904  ;;  %v704_v26 = vpop.permute.xlu0 %703 }
 0x11c   : > { %v910_v27 = vsel %vm908_vm1, %v905_v25, %v907_v0  ;;  %v710_v24 = vsel %vm709_vm11, %v704_v26, %v706_v22  ;;  %v1158_v22 = vld [vmem:[%s2336_s5] sm:$0xff]  ;;  %v1706_v26 = vld [vmem:[%s2336_s5 + $0x18] sm:$0xff] }
 0x11d   : > { %1680 = vmatpush1.msk.msra.mxu0 %vm674_vm8, %v710_v24  ;;  %1693 = vmatpush1.msk.msra.mxu1 %vm888_vm5, %v910_v27 }
 0x11e   : > { %1694 = vmatprep.subr.msk.mxu1 %vm891_vm10, %v927_v11 }
 0x11f   : > { %v775_v28 = vpop.permute.xlu1 %774  ;;  %v773_v29 = vpop.permute.xlu0 %772 }
 0x120   : > { %v777_v30 = vsel %vm405_vm3, %v773_v29, %v775_v28 }
 0x121   : > { %840 = vmatprep.subr.mxu0 %v777_v30 }
 0x123   : > { %v920_v31 = vpop.permute.xlu1 %919  ;;  %v771_v32 = vpop.permute.xlu0 %770 }
 0x124   : > { %v926_v33 = vsel %vm925_vm9, %v920_v31, %v922_v8  ;;  %v776_v34 = vsel %vm405_vm3, %v771_v32, %v773_v29  ;;  %v1070_v8 = vld [vmem:[%s2334_s3] sm:$0xff]  ;;  %vm1074_vm3 = vcmask 64512  }
 0x125   : > { %841 = vmatpush1.msra.mxu0 %v776_v34  ;;  %1695 = vmatpush1.msk.msra.mxu1 %vm890_vm12, %v926_v33 }
 0x126   : > { %1018 = vmatprep.subr.mxu1 %v967_v19 }
 0x127   : > { %v691_v35 = vpop.permute.xlu1 %690  ;;  %v689_v36 = vpop.permute.xlu0 %688 }
 0x128   : > { %v694_v37 = vsel %vm692_vm6, %v689_v36, %v691_v35 }
 0x129   : > { %1681 = vmatprep.subr.msk.mxu0 %vm673_vm14, %v694_v37 }
 0x12b   : > { %v961_v38 = vpop.permute.xlu1 %960  ;;  %v687_v39 = vpop.permute.xlu0 %686 }
 0x12c   : > { %v966_v41 = vsel %vm394_vm15, %v961_v38, %v963_v17  ;;  %v693_v42 = vsel %vm692_vm6, %v687_v39, %v689_v36  ;;  %vm1843_vm15 = vmmov 0  }
 0x12d   : > { %1682 = vmatpush1.msk.msra.mxu0 %vm672_vm7, %v693_v42  ;;  %1019 = vmatpush1.msra.mxu1 %v966_v41 }
 0x12e   : > { %1683 = vmatmul.mubr.msk.f32.vlgmr.msra.gmra.mxu0 %vm417_vm4, %v1669_v40  ;;  %1696 = vmatprep.subr.msk.mxu1 %vm889_vm2, %v910_v27 }
 0x12f   : > { %v903_v43 = vpop.permute.xlu0 %902  ;;  %1728 = vmatprep.mubr.msk.f32.mxu0 %vm1074_vm3, %v1070_v8 }
 0x130   : > { %v909_v45 = vsel %vm908_vm1, %v903_v43, %v905_v25  ;;  %v1704_v25 = vld [vmem:[%s2336_s5 + $0x10] sm:$0xff] }
 0x131   : > { %1697 = vmatpush1.msk.msra.mxu1 %vm888_vm5, %v909_v45 }
 0x132   : > { %1698 = vmatmul.mubr.msk.f32.vlgmr.msra.gmra.mxu1 %vm417_vm4, %v1684_v44  ;;  %1731 = vmatprep.subr.mxu1 %v1833_v4  ;;  %vm1232_vm4 = vcmask 7168  }
 0x133   : > { %1735 = vmatprep.mubr.msk.f32.mxu1 %vm1843_vm15, %v1833_v4 }
 0x139   : > { %v415_v46 = vpop.permute.xlu1 %414 }
 0x13c   : > { %v592_v49 = vpop.permute.xlu0 %591 }
 0x13d   : > { %v807_v9 = vpop.permute.xlu1 %806 }
 0x141   : > { %v985_v59 = vpop.permute.xlu1 %984 }
 0x199   : > { %v487_v47 = vpop.f32.mrf.mxu0 }
 0x19a   : > { %v488_v53 = vadd.f32 %v487_v47, %v415_v46 }
 0x19b   : > { %v489_v50 = vpop.f32.mrf.mxu0 }
 0x19c   : > { %v490_v54 = vadd.f32 %v489_v50, %v415_v46 }
 0x1a1   : > { %v663_v48 = vpop.f32.mrf.mxu1 }
 0x1a2   : > { %v2241_v55 = vadd.f32 %v663_v48, %v592_v49 }
 0x1a3   : > { %v665_v51 = vpop.f32.mrf.mxu1 }
 0x1a4   : > { %v2243_v56 = vadd.f32 %v665_v51, %v592_v49  ;;  %v670_v61 = vadd.f32 %v2241_v55, %v488_v53 }
 0x1a6   : > { %v671_v62 = vadd.f32 %v2243_v56, %v490_v54 }
 0x1ee   : > { %v878_v52 = vpop.f32.mrf.mxu0 }
 0x1ef   : > { %v2245_v57 = vadd.f32 %v878_v52, %v807_v9 }
 0x1f0   : > { %v880_v12 = vpop.f32.mrf.mxu0 }
 0x1f1   : > { %v2247_v58 = vadd.f32 %v880_v12, %v807_v9  ;;  %v886_v1 = vadd.f32 %v2245_v57, %v670_v61 }
 0x1f2   : > { %v1056_v60 = vpop.f32.mrf.mxu1 }
 0x1f3   : > { %v2251_v63 = vadd.f32 %v1056_v60, %v985_v59  ;;  %v887_v2 = vadd.f32 %v2247_v58, %v671_v62 }
 0x1f4   : > { %v1058_v0 = vpop.f32.mrf.mxu1 }
 0x1f5   : > { %v2255_v5 = vadd.f32 %v1058_v0, %v985_v59  ;;  %v2258_v3 = vadd.f32 %v2251_v63, %v886_v1 }
 0x1f7   : > { %v2261_v6 = vadd.f32 %v2255_v5, %v887_v2 }
 0x1f9   : > { %v1066_v7 = vadd.f32 %v2261_v6, %v2258_v3 }
 0x1fb   : > { %1067 = vadd.xlane.f32.xlu0 %v1066_v7 }
 0x284   : > { %v1068_v10 = vpop.xlane.xlu0 %1067 }
 0x285   : > { %v1069_v11 = vmul.f32 0.00390625, %v1068_v10 }
 0x287   : > { %1726 = vmatprep.subr.mxu0 %v1069_v11 }
 0x288   : > { %1727 = vmatpush3.msra.mxu0 %v1069_v11 }
 0x289   : > { %1729 = vmatmul.mubr.msk.f32.vlgmr.msra.gmra.mxu0 %vm1074_vm3, %v1071_v13  ;;  %1738 = vmatprep.subr.mxu0 %v1833_v4 }
 0x28a   : > { %1742 = vmatprep.mubr.msk.f32.mxu0 %vm1843_vm15, %v1833_v4 }
 0x349   : > { %v1730_v15 = vpop.f32.mrf.mxu0 }
 0x34a   : > { %v1153_v17 = vadd.f32 %v1730_v15, %v1073_v14 }
 0x34b   : > { %v1147_v18 = vpop.f32.mrf.mxu0 }
 0x34c   : > { %v1157_v19 = vmax.f32 %v1153_v17, 0.0  ;;  %v1148_v20 = vadd.f32 %v1147_v18, %v1072_v16 }
 0x34e   : > { %v1156_v21 = vmax.f32 %v1148_v20, 0.0  ;;  %1732 = vmatpush3.msra.mxu1 %v1157_v19  ;;  %1739 = vmatpush3.msra.mxu0 %v1157_v19 }
 0x34f   : > { %1733 = vmatprep.subr.mxu1 %v1833_v4  ;;  %1740 = vmatprep.subr.mxu0 %v1833_v4 }
 0x350   : > { %1734 = vmatpush3.msra.mxu1 %v1156_v21  ;;  %1741 = vmatpush3.msra.mxu0 %v1156_v21 }
 0x351   : > { %1736 = vmatmul.mubr.msk.f32.vlgmr.msra.gmra.mxu1 %vm383_vm0, %v1158_v22  ;;  %1743 = vmatmul.mubr.msk.f32.vlgmr.msra.gmra.mxu0 %vm383_vm0, %v1702_v23 }
 0x352   : > { %1745 = vmatprep.subr.mxu1 %v1833_v4  ;;  %1752 = vmatprep.subr.mxu0 %v1833_v4 }
 0x353   : > { %1746 = vmatpush3.msra.mxu1 %v1157_v19  ;;  %1753 = vmatpush3.msra.mxu0 %v1157_v19 }
 0x354   : > { %1747 = vmatprep.subr.mxu1 %v1833_v4  ;;  %1754 = vmatprep.subr.mxu0 %v1833_v4 }
 0x355   : > { %1748 = vmatpush3.msra.mxu1 %v1156_v21  ;;  %1749 = vmatprep.mubr.msk.f32.mxu1 %vm1843_vm15, %v1833_v4 }
 0x356   : > { %1755 = vmatpush3.msra.mxu0 %v1156_v21  ;;  %1756 = vmatprep.mubr.msk.f32.mxu0 %vm1843_vm15, %v1833_v4 }
 0x357   : > { %1750 = vmatmul.mubr.msk.f32.vlgmr.msra.gmra.mxu1 %vm383_vm0, %v1704_v25  ;;  %1757 = vmatmul.mubr.msk.f32.vlgmr.msra.gmra.mxu0 %vm383_vm0, %v1706_v26 }
 0x411   : > { %v1228_v27 = vpop.f32.mrf.mxu1  ;;  %v1332_v24 = vpop.f32.mrf.mxu0 }
 0x412   : > { %v1233_v28 = vsel %vm1232_vm4, %v1228_v27, -inf  ;;  %v1336_v29 = vsel %vm1232_vm4, %v1332_v24, -inf }
 0x413   : > { %v1234_v30 = vrot.slane %v1233_v28, 4  ;;  %v1337_v31 = vrot.slane %v1336_v29, 4  ;;  %v1737_v32 = vpop.f32.mrf.mxu1  ;;  %v1744_v33 = vpop.f32.mrf.mxu0 }
 0x415   : > { %v1235_v34 = vmax.f32 %v1233_v28, %v1234_v30  ;;  %v1338_v35 = vmax.f32 %v1336_v29, %v1337_v31 }
 0x417   : > { %v1236_v36 = vrot.slane %v1235_v34, 2  ;;  %v1339_v37 = vrot.slane %v1338_v35, 2  ;;  %v1437_v4 = vpop.f32.mrf.mxu1  ;;  %v1542_v38 = vpop.f32.mrf.mxu0 }
 0x418   : > { %v1441_v39 = vsel %vm1232_vm4, %v1437_v4, -inf  ;;  %v1546_v40 = vsel %vm1232_vm4, %v1542_v38, -inf }
 0x419   : > { %v1237_v41 = vmax.f32 %v1235_v34, %v1236_v36  ;;  %v1340_v42 = vmax.f32 %v1338_v35, %v1339_v37  ;;  %v1442_v43 = vrot.slane %v1441_v39, 4  ;;  %v1547_v44 = vrot.slane %v1546_v40, 4  ;;  %v1751_v45 = vpop.f32.mrf.mxu1  ;;  %v1758_v46 = vpop.f32.mrf.mxu0 }
 0x41b   : > { %v1238_v47 = vrot.slane %v1237_v41, 1  ;;  %v1341_v48 = vrot.slane %v1340_v42, 1  ;;  %v1443_v49 = vmax.f32 %v1441_v39, %v1442_v43  ;;  %v1548_v9 = vmax.f32 %v1546_v40, %v1547_v44 }
 0x41d   : > { %v1239_v50 = vmax.f32 %v1237_v41, %v1238_v47  ;;  %v1342_v51 = vmax.f32 %v1340_v42, %v1341_v48  ;;  %v1444_v52 = vrot.slane %v1443_v49, 2  ;;  %v1549_v53 = vrot.slane %v1548_v9, 2 }
 0x41f   : > { %v1240_v54 = vsub.f32 %v1228_v27, %v1239_v50  ;;  %v1343_v12 = vsub.f32 %v1332_v24, %v1342_v51  ;;  %v1445_v59 = vmax.f32 %v1443_v49, %v1444_v52  ;;  %v1550_v60 = vmax.f32 %v1548_v9, %v1549_v53 }
 0x421   : > { %v1241_v61 = vmul.f32 1.442695, %v1240_v54  ;;  %v1344_v62 = vmul.f32 1.442695, %v1343_v12  ;;  %v1446_v0 = vrot.slane %v1445_v59, 1  ;;  %v1551_v1 = vrot.slane %v1550_v60, 1 }
 0x423   : > { %1795 = vpow2.f32 %v1241_v61  ;;  %v1447_v2 = vmax.f32 %v1445_v59, %v1446_v0  ;;  %v1552_v7 = vmax.f32 %v1550_v60, %v1551_v1 }
 0x424   : > { %1797 = vpow2.f32 %v1344_v62 }
 0x425   : > { %v1448_v8 = vsub.f32 %v1437_v4, %v1447_v2  ;;  %v1553_v10 = vsub.f32 %v1542_v38, %v1552_v7 }
 0x427   : > { %v1449_v11 = vmul.f32 1.442695, %v1448_v8  ;;  %v1554_v13 = vmul.f32 1.442695, %v1553_v10 }
 0x429   : > { %1799 = vpow2.f32 %v1449_v11 }
 0x42a   : > { %1801 = vpow2.f32 %v1554_v13 }
 0x430   : > { %v1796_v14 = vpop.eup %1795 }
 0x431   : > { %v1798_v15 = vpop.eup %1797  ;;  %v1243_v16 = vsel %vm1232_vm4, %v1796_v14, 0.0 }
 0x432   : > { %v1244_v17 = vrot.slane %v1243_v16, 4  ;;  %v1346_v18 = vsel %vm1232_vm4, %v1798_v15, 0.0 }
 0x433   : > { %v1347_v19 = vrot.slane %v1346_v18, 4 }
 0x434   : > { %v1245_v20 = vadd.f32 %v1244_v17, %v1243_v16 }
 0x435   : > { %v1348_v21 = vadd.f32 %v1347_v19, %v1346_v18 }
 0x436   : > { %v1800_v22 = vpop.eup %1799  ;;  %v1246_v23 = vrot.slane %v1245_v20, 2 }
 0x437   : > { %v1802_v25 = vpop.eup %1801  ;;  %v1349_v26 = vrot.slane %v1348_v21, 2  ;;  %v1451_v27 = vsel %vm1232_vm4, %v1800_v22, 0.0 }
 0x438   : > { %v1247_v24 = vadd.f32 %v1246_v23, %v1245_v20  ;;  %v1452_v28 = vrot.slane %v1451_v27, 4  ;;  %v1556_v29 = vsel %vm1232_vm4, %v1802_v25, 0.0 }
 0x439   : > { %v1350_v30 = vadd.f32 %v1349_v26, %v1348_v21  ;;  %v1557_v31 = vrot.slane %v1556_v29, 4 }
 0x43a   : > { %v1453_v32 = vadd.f32 %v1452_v28, %v1451_v27  ;;  %v1248_v33 = vrot.slane %v1247_v24, 1 }
 0x43b   : > { %v1558_v34 = vadd.f32 %v1557_v31, %v1556_v29  ;;  %v1351_v35 = vrot.slane %v1350_v30, 1 }
 0x43c   : > { %v1454_v36 = vrot.slane %v1453_v32, 2  ;;  %v1249_v37 = vadd.f32 %v1248_v33, %v1247_v24 }
 0x43d   : > { %v1559_v4 = vrot.slane %v1558_v34, 2  ;;  %v1352_v38 = vadd.f32 %v1351_v35, %v1350_v30 }
 0x43e   : > { %v1455_v39 = vadd.f32 %v1454_v36, %v1453_v32  ;;  %1803 = vrcp.f32 %v1249_v37 }
 0x43f   : > { %v1560_v40 = vadd.f32 %v1559_v4, %v1558_v34  ;;  %1805 = vrcp.f32 %v1352_v38 }
 0x440   : > { %v1456_v41 = vrot.slane %v1455_v39, 1 }
 0x441   : > { %v1561_v42 = vrot.slane %v1560_v40, 1 }
 0x442   : > { %v1457_v43 = vadd.f32 %v1456_v41, %v1455_v39 }
 0x443   : > { %v1562_v44 = vadd.f32 %v1561_v42, %v1560_v40 }
 0x444   : > { %1807 = vrcp.f32 %v1457_v43 }
 0x445   : > { %1809 = vrcp.f32 %v1562_v44 }
 0x44b   : > { %v1804_v45 = vpop.eup %1803 }
 0x44c   : > { %v1251_v46 = vmul.f32 %v1804_v45, %v1796_v14  ;;  %v1806_v47 = vpop.eup %1805 }
 0x44d   : > { %v1354_v48 = vmul.f32 %v1806_v47, %v1798_v15 }
 0x44e   : > { %1254 = vperm.xlu1 %1793, %v1251_v46  }
 0x451   : > { %v1808_v49 = vpop.eup %1807 }
 0x452   : > { %1359 = vperm.xlu1 %1793, %v1354_v48   ;;  %v1459_v9 = vmul.f32 %v1808_v49, %v1800_v22  ;;  %v1810_v50 = vpop.eup %1809 }
 0x453   : > { %v1564_v51 = vmul.f32 %v1810_v50, %v1802_v25 }
 0x456   : > { %1464 = vperm.xlu1 %1793, %v1459_v9  }
 0x45a   : > { %1569 = vperm.xlu1 %1793, %v1564_v51  }
 0x4c9   : > { %v1255_v52 = vpop.permute.xlu1 %1254 }
 0x4ca   : > { %v1257_v60 = vmul.f32 %v1255_v52, %v2258_v3  ;;  %v1258_v61 = vmul.f32 %v1255_v52, %v2261_v6 }
 0x4cd   : > { %v1360_v53 = vpop.permute.xlu1 %1359 }
 0x4ce   : > { %v1362_v54 = vmul.f32 %v1360_v53, %v2241_v55  ;;  %v1363_v12 = vmul.f32 %v1360_v53, %v2243_v56 }
 0x4d0   : > { %v1364_v1 = vadd.f32 %v1362_v54, %v1257_v60  ;;  %v1365_v2 = vadd.f32 %v1363_v12, %v1258_v61 }
 0x4d1   : > { %v1465_v59 = vpop.permute.xlu1 %1464 }
 0x4d2   : > { %v1467_v62 = vmul.f32 %v1465_v59, %v2245_v57  ;;  %v1468_v0 = vmul.f32 %v1465_v59, %v2247_v58 }
 0x4d4   : > { %v1469_v8 = vadd.f32 %v1467_v62, %v1364_v1  ;;  %v1470_v10 = vadd.f32 %v1468_v0, %v1365_v2 }
 0x4d5   : > { %v1570_v7 = vpop.permute.xlu1 %1569 }
 0x4d6   : > { %v1572_v11 = vmul.f32 %v1570_v7, %v2251_v63  ;;  %v1573_v55 = vmul.f32 %v1570_v7, %v2255_v5 }
 0x4d8   : > { %v1574_v56 = vadd.f32 %v1572_v11, %v1469_v8  ;;  %v1575_v3 = vadd.f32 %v1573_v55, %v1470_v10 }
 0x4da   : > { %1576 = vst [vmem:[%s251_s16] sm:$0xff] %v1574_v56  ;;  %1577 = vst [vmem:[%s251_s16 + $0x8] sm:$0xff] %v1575_v3 }
 0x4db PF: > { %s16_s21 = sadd.s32 1, %s1817_s21  }
 0x4dc   : > { %p13_p4 = scmp.ge.s32.totalorder %s16_s21, 4  }
 0x4de   :  { %15 = sbr.rel (!%p13_p4) target bundleno = 1 (0x1), region = 85 }

</bundles_post_ra>
